<compile_context>
chip_gen: v6e
topology: v6e:2x2x1
jax: 0.10.0
libtpu: 0.0.40
codegen_flags: <defaults>
</compile_context>

<pallas_src>
import functools
import math

import jax
import jax.numpy as jnp
import numpy as np
from jax.experimental import pallas as pl
from jax.experimental.pallas import tpu as pltpu


def _mha_kernel(*refs, n_heads, d_qk, d_v, mxu_dtype, has_mask, return_attn):
    """One batch-tile (TB batch elements) per grid step.

    QKV projection -> head-batched attention -> fused output projection.
    All matmuls are MXU dots with f32 accumulation; softmax math stays in f32.
    """
    it = iter(refs)
    q_ref, k_ref, v_ref = next(it), next(it), next(it)
    mask_ref = next(it) if has_mask else None
    wq_ref, wk_ref, wv_ref, wo_ref = next(it), next(it), next(it), next(it)
    bq_ref, bk_ref, bv_ref, bo_ref = next(it), next(it), next(it), next(it)
    out_ref = next(it)
    attn_ref = next(it) if return_attn else None

    TB, Lq, Dm = q_ref.shape
    Lk = k_ref.shape[1]
    H = n_heads

    # --- QKV projections: one wide MXU matmul each (scale folded into W_q). ---
    xq = q_ref[...].reshape(TB * Lq, Dm).astype(mxu_dtype)
    xk = k_ref[...].reshape(TB * Lk, Dm).astype(mxu_dtype)
    xv = v_ref[...].reshape(TB * Lk, Dm).astype(mxu_dtype)

    Q = jnp.dot(xq, wq_ref[...], preferred_element_type=jnp.float32) + bq_ref[...]
    K = jnp.dot(xk, wk_ref[...], preferred_element_type=jnp.float32) + bk_ref[...]
    V = jnp.dot(xv, wv_ref[...], preferred_element_type=jnp.float32) + bv_ref[...]

    # --- Head split: ONE reshape+transpose per tensor (no per-head slices). ---
    def to_heads(x, L, d):
        return (x.reshape(TB, L, H, d)
                 .transpose(0, 2, 1, 3)
                 .reshape(TB * H, L, d))

    q_h = to_heads(Q, Lq, d_qk).astype(mxu_dtype)   # (TB*H, Lq, d_qk)
    k_h = to_heads(K, Lk, d_qk).astype(mxu_dtype)   # (TB*H, Lk, d_qk)
    v_h = to_heads(V, Lk, d_v).astype(mxu_dtype)    # (TB*H, Lk, d_v)

    # --- Scores: single batched contraction (no explicit K^T). ---
    s = jnp.einsum('gqd,gkd->gqk', q_h, k_h,
                   preferred_element_type=jnp.float32)   # (TB*H, Lq, Lk) f32

    if has_mask:
        # Additive mask (0 / ~-1e9), shipped bf16, expanded to f32 here; the
        # head broadcast is implicit — no broadcast_to / replicated copies.
        am = mask_ref[...].astype(jnp.float32)           # (TB, Lq, Lk)
        s = (s.reshape(TB, H, Lq, Lk) + am[:, None]).reshape(TB * H, Lq, Lk)

    # --- Numerically-stable f32 softmax; EUP reciprocal + one Newton step. ---
    m = jnp.max(s, axis=-1, keepdims=True)
    e = jnp.exp(s - m)
    denom = jnp.sum(e, axis=-1, keepdims=True)
    inv = pl.reciprocal(denom, approx=True)
    inv = inv * (2.0 - denom * inv)                      # Newton: keeps 1e-5
    p = e * inv                                          # (TB*H, Lq, Lk) f32

    if return_attn:                                      # optional, single dense store
        attn_ref[...] = p.reshape(TB, H, Lq, Lk).astype(attn_ref.dtype)

    # --- PV product (batched) ---
    o = jnp.einsum('gqk,gkd->gqd', p.astype(mxu_dtype), v_h,
                   preferred_element_type=jnp.float32)   # (TB*H, Lq, d_v)

    # --- Merge heads (one transpose) + ONE fused output projection matmul. ---
    o2 = (o.reshape(TB, H, Lq, d_v)
           .transpose(0, 2, 1, 3)
           .reshape(TB * Lq, H * d_v)
           .astype(mxu_dtype))
    out = jnp.dot(o2, wo_ref[...], preferred_element_type=jnp.float32) + bo_ref[...]
    out_ref[...] = out.reshape(TB, Lq, Dm).astype(out_ref.dtype)


def _pick_batch_tile(B, Lq, target_rows=256, min_grid_steps=1):
    """Pack batch elements so TB*Lq fills the MXU M dim (256 rows on v6e/v7x,
    128 is fine on v5e). Extra grid steps are only forced when
    min_grid_steps > 1 (set 2-4 on v7x for its two TensorCores); on single-TC
    v5e/v6e let TB grow to fill the MXU."""
    tb = max(1, min(B, target_rows // max(Lq, 1)))
    if min_grid_steps > 1:
        tb = min(tb, max(1, B // min_grid_steps))
    tb = max(tb, 1)
    while B % tb:
        tb -= 1
    return tb


def _prepare_additive_mask(attn_mask, B, Lq, Lk):
    """Accept (Lq,Lk), (B,Lq,Lk) or (B,1,Lq,Lk); return an ADDITIVE bf16
    (B,Lq,Lk) mask with ~-1e9 at masked positions (nonzero => masked)."""
    m = jnp.asarray(attn_mask)
    if m.ndim == 2:
        m = m[None]
    elif m.ndim == 4:
        m = m[:, 0]
    m = jnp.broadcast_to(m, (B, Lq, Lk))
    add = jnp.where(m != 0, jnp.float32(-1e9), jnp.float32(0.0))
    return add.astype(jnp.bfloat16)


def multi_head_attention(query, key, value, params, *, n_heads, d_qk, d_v,
                         attn_mask=None, return_attn=False,
                         mxu_dtype=jnp.bfloat16, batch_tile=None,
                         min_grid_steps=1):
    """Returns (output [B, Lq, d_model], attn [B, H, Lq, Lk] or None)."""
    B, Lq, Dm = query.shape
    Lk = key.shape[1]
    Hqk = n_heads * d_qk
    Hv = n_heads * d_v

    TB = batch_tile if batch_tile is not None else _pick_batch_tile(
        B, Lq, min_grid_steps=min_grid_steps)
    assert B % TB == 0, "batch tile must divide batch size"

    has_mask = attn_mask is not None

    # Fold the attention scale into W_q / b_q; transpose weights so every
    # in-kernel matmul is plain row-major x @ W. Weights live in mxu_dtype.
    scale = 1.0 / math.sqrt(d_qk)
    wqT = (params["W_q"].T * scale).astype(mxu_dtype)            # [Dm, H*d_qk]
    wkT = params["W_k"].T.astype(mxu_dtype)                      # [Dm, H*d_qk]
    wvT = params["W_v"].T.astype(mxu_dtype)                      # [Dm, H*d_v]
    woT = params["W_o"].T.astype(mxu_dtype)                      # [H*d_v, Dm]
    bq = (params["b_q"] * scale).reshape(1, Hqk).astype(jnp.float32)
    bk = params["b_k"].reshape(1, Hqk).astype(jnp.float32)
    bv = params["b_v"].reshape(1, Hv).astype(jnp.float32)
    bo = params["b_o"].reshape(1, Dm).astype(jnp.float32)

    kernel = functools.partial(_mha_kernel, n_heads=n_heads, d_qk=d_qk,
                               d_v=d_v, mxu_dtype=mxu_dtype,
                               has_mask=has_mask, return_attn=return_attn)

    in_specs = [
        pl.BlockSpec((TB, Lq, Dm), lambda b: (b, 0, 0)),   # query
        pl.BlockSpec((TB, Lk, Dm), lambda b: (b, 0, 0)),   # key
        pl.BlockSpec((TB, Lk, Dm), lambda b: (b, 0, 0)),   # value
    ]
    inputs = [query, key, value]
    if has_mask:
        add_mask = _prepare_additive_mask(attn_mask, B, Lq, Lk)
        in_specs.append(pl.BlockSpec((TB, Lq, Lk), lambda b: (b, 0, 0)))
        inputs.append(add_mask)
    in_specs += [
        pl.BlockSpec((Dm, Hqk), lambda b: (0, 0)),         # W_q^T * scale
        pl.BlockSpec((Dm, Hqk), lambda b: (0, 0)),         # W_k^T
        pl.BlockSpec((Dm, Hv), lambda b: (0, 0)),          # W_v^T
        pl.BlockSpec((Hv, Dm), lambda b: (0, 0)),          # W_o^T slab
        pl.BlockSpec((1, Hqk), lambda b: (0, 0)),          # b_q * scale
        pl.BlockSpec((1, Hqk), lambda b: (0, 0)),          # b_k
        pl.BlockSpec((1, Hv), lambda b: (0, 0)),           # b_v
        pl.BlockSpec((1, Dm), lambda b: (0, 0)),           # b_o
    ]
    inputs += [wqT, wkT, wvT, woT, bq, bk, bv, bo]

    out_shape = [jax.ShapeDtypeStruct((B, Lq, Dm), query.dtype)]
    out_specs = [pl.BlockSpec((TB, Lq, Dm), lambda b: (b, 0, 0))]
    if return_attn:
        # Probabilities stored in the input dtype, single dense store per step.
        out_shape.append(jax.ShapeDtypeStruct((B, n_heads, Lq, Lk), query.dtype))
        out_specs.append(pl.BlockSpec((TB, n_heads, Lq, Lk),
                                      lambda b: (b, 0, 0, 0)))

    results = pl.pallas_call(
        kernel,
        out_shape=tuple(out_shape),
        grid_spec=pltpu.PrefetchScalarGridSpec(
            num_scalar_prefetch=0,
            grid=(B // TB,),
            in_specs=in_specs,
            out_specs=tuple(out_specs),
        ),
        compiler_params=pltpu.CompilerParams(
            dimension_semantics=("parallel",),
            vmem_limit_bytes=48 * 1024 * 1024,   # v7x-safe (64 MiB physical)
        ),
    )(*inputs)

    if return_attn:
        out, attn = results
        return out, attn
    (out,) = results
    return out, None


def init_params(key, n_heads, d_model, d_qk, d_v):
    """Deterministic re-implementation of MultiHeadAttention.reset_parameters."""
    stdv = 1.0 / math.sqrt(d_model)
    k1, k2, k3, k4 = jax.random.split(key, 4)
    u = lambda k, shape: jax.random.uniform(k, shape, jnp.float32, -stdv, stdv)
    return {
        "W_q": u(k1, (n_heads * d_qk, d_model)),
        "W_k": u(k2, (n_heads * d_qk, d_model)),
        "W_v": u(k3, (n_heads * d_v, d_model)),
        "W_o": u(k4, (d_model, n_heads * d_v)),
        "b_q": jnp.zeros((n_heads * d_qk,), jnp.float32),
        "b_k": jnp.zeros((n_heads * d_qk,), jnp.float32),
        "b_v": jnp.zeros((n_heads * d_v,), jnp.float32),
        "b_o": jnp.zeros((d_model,), jnp.float32),
    }


def reference_mha(query, key, value, params, *, n_heads, d_qk, d_v,
                  attn_mask=None):
    """Plain-JAX reference mirroring the PyTorch forward (eval mode)."""
    B, Lq, _ = query.shape
    Lk = key.shape[1]
    Q = query @ params["W_q"].T + params["b_q"]
    K = key @ params["W_k"].T + params["b_k"]
    V = value @ params["W_v"].T + params["b_v"]
    Q = Q.reshape(B, Lq, n_heads, d_qk).transpose(0, 2, 1, 3)
    K = K.reshape(B, Lk, n_heads, d_qk).transpose(0, 2, 1, 3)
    V = V.reshape(B, Lk, n_heads, d_v).transpose(0, 2, 1, 3)
    scores = jnp.einsum("bhqd,bhkd->bhqk", Q, K) / np.sqrt(d_qk)
    if attn_mask is not None:
        scores = jnp.where(attn_mask[:, None, :, :] != 0, -1e9, scores)
    attn = jax.nn.softmax(scores, axis=-1)
    out = jnp.einsum("bhqk,bhkd->bhqd", attn, V)
    out = out.transpose(0, 2, 1, 3).reshape(B, Lq, n_heads * d_v)
    out = out @ params["W_o"].T + params["b_o"]
    return out, attn


if __name__ == "__main__":
    n_heads, d_model, d_qk, d_v = 4, 32, 8, 8
    B, L = 2, 8

    key = jax.random.PRNGKey(0)
    kp, kq, kk, kv = jax.random.split(key, 4)
    params = init_params(kp, n_heads, d_model, d_qk, d_v)
    query = jax.random.normal(kq, (B, L, d_model), jnp.float32)
    keyx = jax.random.normal(kk, (B, L, d_model), jnp.float32)
    value = jax.random.normal(kv, (B, L, d_model), jnp.float32)

    # --- masked path (causal mask, nonzero => masked), f32 MXU, 1e-5 check ---
    causal2d = (jnp.arange(L)[None, :] > jnp.arange(L)[:, None]).astype(jnp.float32)
    mask3d = jnp.broadcast_to(causal2d, (B, L, L))

    out_m, attn_m = multi_head_attention(query, keyx, value, params,
                                         n_heads=n_heads, d_qk=d_qk, d_v=d_v,
                                         attn_mask=causal2d, return_attn=True,
                                         mxu_dtype=jnp.float32)
    jax.block_until_ready((out_m, attn_m))
    ref_out_m, ref_attn_m = reference_mha(query, keyx, value, params,
                                          n_heads=n_heads, d_qk=d_qk, d_v=d_v,
                                          attn_mask=mask3d)
    np.testing.assert_allclose(np.asarray(out_m), np.asarray(ref_out_m),
                               rtol=1e-5, atol=1e-5)
    np.testing.assert_allclose(np.asarray(attn_m), np.asarray(ref_attn_m),
                               rtol=1e-5, atol=1e-5)

    # --- unmasked path, f32 MXU, 1e-5 check ---
    out, attn = multi_head_attention(query, keyx, value, params,
                                     n_heads=n_heads, d_qk=d_qk, d_v=d_v,
                                     return_attn=True, mxu_dtype=jnp.float32)
    jax.block_until_ready((out, attn))
    ref_out, ref_attn = reference_mha(query, keyx, value, params,
                                      n_heads=n_heads, d_qk=d_qk, d_v=d_v)
    np.testing.assert_allclose(np.asarray(out), np.asarray(ref_out),
                               rtol=1e-5, atol=1e-5)
    np.testing.assert_allclose(np.asarray(attn), np.asarray(ref_attn),
                               rtol=1e-5, atol=1e-5)

    # --- production path: bf16 MXU inputs (default), no attn writeback ---
    out_bf, attn_none = multi_head_attention(query, keyx, value, params,
                                             n_heads=n_heads, d_qk=d_qk, d_v=d_v)
    jax.block_until_ready(out_bf)
    assert attn_none is None
    np.testing.assert_allclose(np.asarray(out_bf), np.asarray(ref_out),
                               rtol=5e-2, atol=5e-2)

    print("KERNEL_OK")
</pallas_src>

<mosaic_0001>
module attributes {stable_mosaic.version = 11 : i64} {
  func.func @_mha_kernel(%arg0: i32, %arg1: memref<2x8x32xf32, #tpu.memory_space<vmem>>, %arg2: memref<2x8x32xf32, #tpu.memory_space<vmem>>, %arg3: memref<2x8x32xf32, #tpu.memory_space<vmem>>, %arg4: memref<2x8x8xbf16, #tpu.memory_space<vmem>>, %arg5: memref<32x32xf32, #tpu.memory_space<vmem>>, %arg6: memref<32x32xf32, #tpu.memory_space<vmem>>, %arg7: memref<32x32xf32, #tpu.memory_space<vmem>>, %arg8: memref<32x32xf32, #tpu.memory_space<vmem>>, %arg9: memref<1x32xf32, #tpu.memory_space<vmem>>, %arg10: memref<1x32xf32, #tpu.memory_space<vmem>>, %arg11: memref<1x32xf32, #tpu.memory_space<vmem>>, %arg12: memref<1x32xf32, #tpu.memory_space<vmem>>, %arg13: memref<2x8x32xf32, #tpu.memory_space<vmem>>, %arg14: memref<2x4x8x8xf32, #tpu.memory_space<vmem>>) attributes {dimension_semantics = [#tpu.dimension_semantics<parallel>], iteration_bounds = array<i64: 1>, scalar_prefetch = 0 : i64, scratch_operands = 0 : i64, tpu.core_type = #tpu.core_type<tc>, window_params = [{transform_indices = @transform_0, window_bounds = array<i64: 2, 8, 32>}, {transform_indices = @transform_1, window_bounds = array<i64: 2, 8, 32>}, {transform_indices = @transform_2, window_bounds = array<i64: 2, 8, 32>}, {transform_indices = @transform_3, window_bounds = array<i64: 2, 8, 8>}, {pipeline_mode = #tpu.pipeline_mode<synchronous>, transform_indices = @transform_4, window_bounds = array<i64: 32, 32>}, {pipeline_mode = #tpu.pipeline_mode<synchronous>, transform_indices = @transform_5, window_bounds = array<i64: 32, 32>}, {pipeline_mode = #tpu.pipeline_mode<synchronous>, transform_indices = @transform_6, window_bounds = array<i64: 32, 32>}, {pipeline_mode = #tpu.pipeline_mode<synchronous>, transform_indices = @transform_7, window_bounds = array<i64: 32, 32>}, {pipeline_mode = #tpu.pipeline_mode<synchronous>, transform_indices = @transform_8, window_bounds = array<i64: 1, 32>}, {pipeline_mode = #tpu.pipeline_mode<synchronous>, transform_indices = @transform_9, window_bounds = array<i64: 1, 32>}, {pipeline_mode = #tpu.pipeline_mode<synchronous>, transform_indices = @transform_10, window_bounds = array<i64: 1, 32>}, {pipeline_mode = #tpu.pipeline_mode<synchronous>, transform_indices = @transform_11, window_bounds = array<i64: 1, 32>}, {transform_indices = @transform_12, window_bounds = array<i64: 2, 8, 32>}, {transform_indices = @transform_13, window_bounds = array<i64: 2, 4, 8, 8>}]} {
    %c0 = arith.constant 0 : index
    %c0_0 = arith.constant 0 : index
    %c0_1 = arith.constant 0 : index
    %0 = vector.load %arg1[%c0, %c0_0, %c0_1] : memref<2x8x32xf32, #tpu.memory_space<vmem>>, vector<2x8x32xf32>
    %1 = vector.shape_cast %0 : vector<2x8x32xf32> to vector<16x32xf32>
    %c0_2 = arith.constant 0 : index
    %c0_3 = arith.constant 0 : index
    %c0_4 = arith.constant 0 : index
    %2 = vector.load %arg2[%c0_2, %c0_3, %c0_4] : memref<2x8x32xf32, #tpu.memory_space<vmem>>, vector<2x8x32xf32>
    %3 = vector.shape_cast %2 : vector<2x8x32xf32> to vector<16x32xf32>
    %c0_5 = arith.constant 0 : index
    %c0_6 = arith.constant 0 : index
    %c0_7 = arith.constant 0 : index
    %4 = vector.load %arg3[%c0_5, %c0_6, %c0_7] : memref<2x8x32xf32, #tpu.memory_space<vmem>>, vector<2x8x32xf32>
    %5 = vector.shape_cast %4 : vector<2x8x32xf32> to vector<16x32xf32>
    %c0_8 = arith.constant 0 : index
    %c0_9 = arith.constant 0 : index
    %6 = vector.load %arg5[%c0_8, %c0_9] : memref<32x32xf32, #tpu.memory_space<vmem>>, vector<32x32xf32>
    %cst = arith.constant dense<0.000000e+00> : vector<16x32xf32>
    %7 = tpu.matmul %1, %6, %cst {dimension_numbers = #tpu.dot_dimension_numbers<[1], [0], [0], [1], [0, 0, 1, 1], [], []>} : vector<16x32xf32>, vector<32x32xf32>, vector<16x32xf32> -> vector<16x32xf32>
    %c0_10 = arith.constant 0 : index
    %c0_11 = arith.constant 0 : index
    %8 = vector.load %arg9[%c0_10, %c0_11] : memref<1x32xf32, #tpu.memory_space<vmem>>, vector<1x32xf32>
    %9 = vector.broadcast %8 : vector<1x32xf32> to vector<16x32xf32>
    %10 = arith.addf %7, %9 : vector<16x32xf32>
    %c0_12 = arith.constant 0 : index
    %c0_13 = arith.constant 0 : index
    %11 = vector.load %arg6[%c0_12, %c0_13] : memref<32x32xf32, #tpu.memory_space<vmem>>, vector<32x32xf32>
    %cst_14 = arith.constant dense<0.000000e+00> : vector<16x32xf32>
    %12 = tpu.matmul %3, %11, %cst_14 {dimension_numbers = #tpu.dot_dimension_numbers<[1], [0], [0], [1], [0, 0, 1, 1], [], []>} : vector<16x32xf32>, vector<32x32xf32>, vector<16x32xf32> -> vector<16x32xf32>
    %c0_15 = arith.constant 0 : index
    %c0_16 = arith.constant 0 : index
    %13 = vector.load %arg10[%c0_15, %c0_16] : memref<1x32xf32, #tpu.memory_space<vmem>>, vector<1x32xf32>
    %14 = vector.broadcast %13 : vector<1x32xf32> to vector<16x32xf32>
    %15 = arith.addf %12, %14 : vector<16x32xf32>
    %c0_17 = arith.constant 0 : index
    %c0_18 = arith.constant 0 : index
    %16 = vector.load %arg7[%c0_17, %c0_18] : memref<32x32xf32, #tpu.memory_space<vmem>>, vector<32x32xf32>
    %cst_19 = arith.constant dense<0.000000e+00> : vector<16x32xf32>
    %17 = tpu.matmul %5, %16, %cst_19 {dimension_numbers = #tpu.dot_dimension_numbers<[1], [0], [0], [1], [0, 0, 1, 1], [], []>} : vector<16x32xf32>, vector<32x32xf32>, vector<16x32xf32> -> vector<16x32xf32>
    %c0_20 = arith.constant 0 : index
    %c0_21 = arith.constant 0 : index
    %18 = vector.load %arg11[%c0_20, %c0_21] : memref<1x32xf32, #tpu.memory_space<vmem>>, vector<1x32xf32>
    %19 = vector.broadcast %18 : vector<1x32xf32> to vector<16x32xf32>
    %20 = arith.addf %17, %19 : vector<16x32xf32>
    %21 = vector.shape_cast %10 : vector<16x32xf32> to vector<2x8x4x8xf32>
    %22 = tpu.transpose %21, [0, 2, 1, 3] : vector<2x8x4x8xf32> -> vector<2x4x8x8xf32>
    %23 = vector.shape_cast %22 : vector<2x4x8x8xf32> to vector<8x8x8xf32>
    %24 = vector.shape_cast %15 : vector<16x32xf32> to vector<2x8x4x8xf32>
    %25 = tpu.transpose %24, [0, 2, 1, 3] : vector<2x8x4x8xf32> -> vector<2x4x8x8xf32>
    %26 = vector.shape_cast %25 : vector<2x4x8x8xf32> to vector<8x8x8xf32>
    %27 = vector.shape_cast %20 : vector<16x32xf32> to vector<2x8x4x8xf32>
    %28 = tpu.transpose %27, [0, 2, 1, 3] : vector<2x8x4x8xf32> -> vector<2x4x8x8xf32>
    %29 = vector.shape_cast %28 : vector<2x4x8x8xf32> to vector<8x8x8xf32>
    "tpu.trace_start"() <{level = 10 : i32, message = "gqd,gkd->gqk"}> : () -> ()
    %cst_22 = arith.constant dense<0.000000e+00> : vector<8x8x8xf32>
    %30 = tpu.matmul %23, %26, %cst_22 {dimension_numbers = #tpu.dot_dimension_numbers<[2], [2], [1], [1], [0, 0, 0, 1, 1, 1], [0], [0]>} : vector<8x8x8xf32>, vector<8x8x8xf32>, vector<8x8x8xf32> -> vector<8x8x8xf32>
    "tpu.trace_stop"() : () -> ()
    %c0_23 = arith.constant 0 : index
    %c0_24 = arith.constant 0 : index
    %c0_25 = arith.constant 0 : index
    %31 = vector.load %arg4[%c0_23, %c0_24, %c0_25] : memref<2x8x8xbf16, #tpu.memory_space<vmem>>, vector<2x8x8xbf16>
    %32 = arith.extf %31 : vector<2x8x8xbf16> to vector<2x8x8xf32>
    %33 = vector.shape_cast %30 : vector<8x8x8xf32> to vector<2x4x8x8xf32>
    %34 = vector.shape_cast %32 : vector<2x8x8xf32> to vector<2x1x8x8xf32>
    %35 = vector.broadcast %34 : vector<2x1x8x8xf32> to vector<2x4x8x8xf32>
    %36 = arith.addf %33, %35 : vector<2x4x8x8xf32>
    %37 = vector.shape_cast %36 : vector<2x4x8x8xf32> to vector<8x8x8xf32>
    %cst_26 = arith.constant dense<0xFF800000> : vector<8x8xf32>
    %38 = vector.multi_reduction <maximumf>, %37, %cst_26 [2] : vector<8x8x8xf32> to vector<8x8xf32>
    %39 = vector.shape_cast %38 : vector<8x8xf32> to vector<8x8x1xf32>
    %40 = vector.broadcast %39 : vector<8x8x1xf32> to vector<8x8x8xf32>
    %41 = arith.subf %37, %40 : vector<8x8x8xf32>
    %42 = math.exp %41 : vector<8x8x8xf32>
    %cst_27 = arith.constant dense<0.000000e+00> : vector<8x8xf32>
    %43 = vector.multi_reduction <add>, %42, %cst_27 [2] : vector<8x8x8xf32> to vector<8x8xf32>
    %44 = vector.shape_cast %43 : vector<8x8xf32> to vector<8x8x1xf32>
    %45 = tpu.reciprocal %44 {approx = true} : vector<8x8x1xf32> -> vector<8x8x1xf32>
    %46 = arith.mulf %44, %45 : vector<8x8x1xf32>
    %cst_28 = arith.constant 2.000000e+00 : f32
    %47 = vector.broadcast %cst_28 : f32 to vector<8x8x1xf32>
    %48 = arith.subf %47, %46 : vector<8x8x1xf32>
    %49 = arith.mulf %45, %48 : vector<8x8x1xf32>
    %50 = vector.broadcast %49 : vector<8x8x1xf32> to vector<8x8x8xf32>
    %51 = arith.mulf %42, %50 : vector<8x8x8xf32>
    %52 = vector.shape_cast %51 : vector<8x8x8xf32> to vector<2x4x8x8xf32>
    %c0_29 = arith.constant 0 : index
    %c0_30 = arith.constant 0 : index
    %c0_31 = arith.constant 0 : index
    %c0_32 = arith.constant 0 : index
    %53 = vector.load %arg14[%c0_29, %c0_30, %c0_31, %c0_32] : memref<2x4x8x8xf32, #tpu.memory_space<vmem>>, vector<2x4x8x8xf32>
    tpu.vector_store %arg14[%c0_29, %c0_30, %c0_31, %c0_32], %52 {strides = array<i32>} : memref<2x4x8x8xf32, #tpu.memory_space<vmem>>, vector<2x4x8x8xf32>,
    "tpu.trace_start"() <{level = 10 : i32, message = "gqk,gkd->gqd"}> : () -> ()
    %cst_33 = arith.constant dense<0.000000e+00> : vector<8x8x8xf32>
    %54 = tpu.matmul %51, %29, %cst_33 {dimension_numbers = #tpu.dot_dimension_numbers<[2], [1], [1], [2], [0, 0, 0, 1, 1, 2], [0], [0]>} : vector<8x8x8xf32>, vector<8x8x8xf32>, vector<8x8x8xf32> -> vector<8x8x8xf32>
    "tpu.trace_stop"() : () -> ()
    %55 = vector.shape_cast %54 : vector<8x8x8xf32> to vector<2x4x8x8xf32>
    %56 = tpu.transpose %55, [0, 2, 1, 3] : vector<2x4x8x8xf32> -> vector<2x8x4x8xf32>
    %57 = vector.shape_cast %56 : vector<2x8x4x8xf32> to vector<16x32xf32>
    %c0_34 = arith.constant 0 : index
    %c0_35 = arith.constant 0 : index
    %58 = vector.load %arg8[%c0_34, %c0_35] : memref<32x32xf32, #tpu.memory_space<vmem>>, vector<32x32xf32>
    %cst_36 = arith.constant dense<0.000000e+00> : vector<16x32xf32>
    %59 = tpu.matmul %57, %58, %cst_36 {dimension_numbers = #tpu.dot_dimension_numbers<[1], [0], [0], [1], [0, 0, 1, 1], [], []>} : vector<16x32xf32>, vector<32x32xf32>, vector<16x32xf32> -> vector<16x32xf32>
    %c0_37 = arith.constant 0 : index
    %c0_38 = arith.constant 0 : index
    %60 = vector.load %arg12[%c0_37, %c0_38] : memref<1x32xf32, #tpu.memory_space<vmem>>, vector<1x32xf32>
    %61 = vector.broadcast %60 : vector<1x32xf32> to vector<16x32xf32>
    %62 = arith.addf %59, %61 : vector<16x32xf32>
    %63 = vector.shape_cast %62 : vector<16x32xf32> to vector<2x8x32xf32>
    %c0_39 = arith.constant 0 : index
    %c0_40 = arith.constant 0 : index
    %c0_41 = arith.constant 0 : index
    %64 = vector.load %arg13[%c0_39, %c0_40, %c0_41] : memref<2x8x32xf32, #tpu.memory_space<vmem>>, vector<2x8x32xf32>
    tpu.vector_store %arg13[%c0_39, %c0_40, %c0_41], %63 {strides = array<i32>} : memref<2x8x32xf32, #tpu.memory_space<vmem>>, vector<2x8x32xf32>,
    return
  }
  func.func @transform_0(%arg0: i32) -> (i32, i32, i32) {
    %c0_i32 = arith.constant 0 : i32
    %c0_i32_0 = arith.constant 0 : i32
    %c0_i32_1 = arith.constant 0 : i32
    return %arg0, %c0_i32, %c0_i32_0 : i32, i32, i32
  }
  func.func @transform_1(%arg0: i32) -> (i32, i32, i32) {
    %c0_i32 = arith.constant 0 : i32
    %c0_i32_0 = arith.constant 0 : i32
    %c0_i32_1 = arith.constant 0 : i32
    return %arg0, %c0_i32, %c0_i32_0 : i32, i32, i32
  }
  func.func @transform_2(%arg0: i32) -> (i32, i32, i32) {
    %c0_i32 = arith.constant 0 : i32
    %c0_i32_0 = arith.constant 0 : i32
    %c0_i32_1 = arith.constant 0 : i32
    return %arg0, %c0_i32, %c0_i32_0 : i32, i32, i32
  }
  func.func @transform_3(%arg0: i32) -> (i32, i32, i32) {
    %c0_i32 = arith.constant 0 : i32
    %c0_i32_0 = arith.constant 0 : i32
    %c0_i32_1 = arith.constant 0 : i32
    return %arg0, %c0_i32, %c0_i32_0 : i32, i32, i32
  }
  func.func @transform_4(%arg0: i32) -> (i32, i32) {
    %c0_i32 = arith.constant 0 : i32
    %c0_i32_0 = arith.constant 0 : i32
    %c0_i32_1 = arith.constant 0 : i32
    return %c0_i32, %c0_i32_0 : i32, i32
  }
  func.func @transform_5(%arg0: i32) -> (i32, i32) {
    %c0_i32 = arith.constant 0 : i32
    %c0_i32_0 = arith.constant 0 : i32
    %c0_i32_1 = arith.constant 0 : i32
    return %c0_i32, %c0_i32_0 : i32, i32
  }
  func.func @transform_6(%arg0: i32) -> (i32, i32) {
    %c0_i32 = arith.constant 0 : i32
    %c0_i32_0 = arith.constant 0 : i32
    %c0_i32_1 = arith.constant 0 : i32
    return %c0_i32, %c0_i32_0 : i32, i32
  }
  func.func @transform_7(%arg0: i32) -> (i32, i32) {
    %c0_i32 = arith.constant 0 : i32
    %c0_i32_0 = arith.constant 0 : i32
    %c0_i32_1 = arith.constant 0 : i32
    return %c0_i32, %c0_i32_0 : i32, i32
  }
  func.func @transform_8(%arg0: i32) -> (i32, i32) {
    %c0_i32 = arith.constant 0 : i32
    %c0_i32_0 = arith.constant 0 : i32
    %c0_i32_1 = arith.constant 0 : i32
    return %c0_i32, %c0_i32_0 : i32, i32
  }
  func.func @transform_9(%arg0: i32) -> (i32, i32) {
    %c0_i32 = arith.constant 0 : i32
    %c0_i32_0 = arith.constant 0 : i32
    %c0_i32_1 = arith.constant 0 : i32
    return %c0_i32, %c0_i32_0 : i32, i32
  }
  func.func @transform_10(%arg0: i32) -> (i32, i32) {
    %c0_i32 = arith.constant 0 : i32
    %c0_i32_0 = arith.constant 0 : i32
    %c0_i32_1 = arith.constant 0 : i32
    return %c0_i32, %c0_i32_0 : i32, i32
  }
  func.func @transform_11(%arg0: i32) -> (i32, i32) {
    %c0_i32 = arith.constant 0 : i32
    %c0_i32_0 = arith.constant 0 : i32
    %c0_i32_1 = arith.constant 0 : i32
    return %c0_i32, %c0_i32_0 : i32, i32
  }
  func.func @transform_12(%arg0: i32) -> (i32, i32, i32) {
    %c0_i32 = arith.constant 0 : i32
    %c0_i32_0 = arith.constant 0 : i32
    %c0_i32_1 = arith.constant 0 : i32
    return %arg0, %c0_i32, %c0_i32_0 : i32, i32, i32
  }
  func.func @transform_13(%arg0: i32) -> (i32, i32, i32, i32) {
    %c0_i32 = arith.constant 0 : i32
    %c0_i32_0 = arith.constant 0 : i32
    %c0_i32_1 = arith.constant 0 : i32
    %c0_i32_2 = arith.constant 0 : i32
    return %arg0, %c0_i32, %c0_i32_0, %c0_i32_1 : i32, i32, i32, i32
  }
}

</mosaic_0001>

<bundles_post_ra>
// kernel: tpu_custom_call.1
= control target key start
LH: loop header
LB: loop body
LE: loop exit
PB: predicated region body
PF: predicated region fallthrough
CT: control target
= control target key end

     0   :  { %19 = vsyncpa [#allocation3], 0  ;;  %s4121_s0 = inlined_call_operand.hbm [shape: f32[2,8,32], index: 0, kind: input, shape index: {}]   ;;  %s4122_s1 = inlined_call_operand.hbm [shape: f32[2,8,32], index: 1, kind: input, shape index: {}]   ;;  %s4123_s2 = inlined_call_operand.hbm [shape: f32[2,8,32], index: 2, kind: input, shape index: {}]   ;;  %s4124_s3 = inlined_call_operand.hbm [shape: bf16[2,8,8], index: 3, kind: input, shape index: {}]   ;;  %s4125_s4 = inlined_call_operand.hbm [shape: f32[32,32], index: 4, kind: input, shape index: {}]   ;;  %s4126_s5 = inlined_call_operand.hbm [shape: f32[32,32], index: 5, kind: input, shape index: {}]   ;;  %s4127_s6 = inlined_call_operand.hbm [shape: f32[32,32], index: 6, kind: input, shape index: {}]   ;;  %s4128_s7 = inlined_call_operand.hbm [shape: f32[32,32], index: 7, kind: input, shape index: {}]   ;;  %s4129_s8 = inlined_call_operand.vmem [shape: f32[1,32], index: 8, kind: input, shape index: {}]   ;;  %s4130_s9 = inlined_call_operand.vmem [shape: f32[1,32], index: 9, kind: input, shape index: {}]   ;;  %s4131_s10 = inlined_call_operand.vmem [shape: f32[1,32], index: 10, kind: input, shape index: {}]   ;;  %s4132_s11 = inlined_call_operand.vmem [shape: f32[1,32], index: 11, kind: input, shape index: {}]   ;;  %s4133_s12 = inlined_call_operand.hbm [shape: f32[2,8,32], index: 12, kind: output, shape index: {0}]   ;;  %s4134_s13 = inlined_call_operand.hbm [shape: f32[2,4,8,8], index: 13, kind: output, shape index: {1}]  }
   0x1   :  { %20 = vsyncpa [#allocation6], 0 }
   0x2   :  { %21 = vsyncpa [#allocation9], 0 }
   0x3   :  { %22 = vsyncpa [#allocation12], 0 }
   0x4   :  { %23 = vsyncpa [#allocation15], 0 }
   0x5   :  { %24 = vsyncpa [#allocation4], 0 }
   0x6   :  { %25 = vsyncpa [#allocation18], 0  ;;  %s3578_s25 = smov [#allocation5]   ;;  %s3579_s27 = smov [#allocation8]  }
   0x7   :  { %s43_s26 = sshll.u32 %s3578_s25, 4  ;;  %s67_s28 = sshll.u32 %s3579_s27, 4  ;;  %s44_s26 = int_to_ptr.vmem [resolvable:$true] %s43_s26  ;;  %s68_s28 = int_to_ptr.vmem [resolvable:$true] %s67_s28 }
   0x8   :  { %s3372_s29 = scalar_lea.vmem %s44_s26, 256  ;;  %p3377_p1 = scmp.lt.s32.totalorder %s44_s26, %s44_s26 }
   0x9   :  { %p3373_p0 = scmp.ne.s32.totalorder %s44_s26, %s3372_s29  ;;  %p3378_p2 = scmp.lt.s32.totalorder %s3372_s29, %s3372_s29 }
   0xb   :  { %p3379_p3 = por %p3378_p2, %p3377_p1 }
   0xd   :  { %p3380_p4 = pnand %p3379_p3, %p3373_p0 }
   0xf   :  { %3383 = shalt.err (!%p3380_p4)
}
  0x10   :  { %s3580_s30 = smov 128   ;;  %s3581_s14 = smov 8  }
  0x11   :  { %49 = dma.hbm_to_vmem [thread:$0]  %s4122_s1, 256, %s44_s26, [#allocation6], %s3580_s30, %s3580_s30, %s3581_s14  }
  0x12   :  { %s3392_s17 = scalar_lea.vmem %s68_s28, 128  ;;  %p3397_p6 = scmp.lt.s32.totalorder %s68_s28, %s68_s28 }
  0x13   :  { %p3393_p5 = scmp.ne.s32.totalorder %s68_s28, %s3392_s17  ;;  %p3398_p7 = scmp.lt.s32.totalorder %s3392_s17, %s3392_s17 }
  0x15   :  { %p3399_p8 = por %p3398_p7, %p3397_p6 }
  0x17   :  { %p3400_p9 = pnand %p3399_p8, %p3393_p5 }
  0x19   :  { %3403 = shalt.err (!%p3400_p9)
}
  0x1a   :  { %s3582_s18 = smov 64   ;;  %s3583_s19 = smov 4  }
  0x1b   :  { %73 = dma.hbm_to_vmem [thread:$0]  %s4124_s3, 128, %s68_s28, [#allocation9], %s3582_s18, %s3582_s18, %s3583_s19  }
  0x1c   :  { %s3584_s22 = smov [#allocation11]   ;;  %s3585_s24 = smov [#allocation2]  }
  0x1d   :  { %s91_s23 = sshll.u32 %s3584_s22, 4  ;;  %s31_s25 = sshll.u32 %s3585_s24, 4  ;;  %s92_s23 = int_to_ptr.vmem [resolvable:$true] %s91_s23  ;;  %s32_s25 = int_to_ptr.vmem [resolvable:$true] %s31_s25 }
  0x1e   :  { %s3412_s1 = scalar_lea.vmem %s92_s23, 512  ;;  %p3417_p11 = scmp.lt.s32.totalorder %s92_s23, %s92_s23 }
  0x1f   :  { %p3413_p10 = scmp.ne.s32.totalorder %s92_s23, %s3412_s1  ;;  %p3418_p12 = scmp.lt.s32.totalorder %s3412_s1, %s3412_s1 }
  0x21   :  { %p3419_p13 = por %p3418_p12, %p3417_p11 }
  0x23   :  { %p3420_p0 = pnand %p3419_p13, %p3413_p10 }
  0x25   :  { %3423 = shalt.err (!%p3420_p0)
}
  0x26   :  { %97 = dma.hbm_to_vmem [thread:$0]  %s4126_s5, 512, %s92_s23, [#allocation12], %s3580_s30, %s3580_s30, %s3581_s14  }
  0x27   :  { %s3432_s3 = scalar_lea.vmem %s32_s25, 256  ;;  %p3437_p2 = scmp.lt.s32.totalorder %s32_s25, %s32_s25 }
  0x28   :  { %p3433_p1 = scmp.ne.s32.totalorder %s32_s25, %s3432_s3  ;;  %p3438_p3 = scmp.lt.s32.totalorder %s3432_s3, %s3432_s3 }
  0x2a   :  { %p3439_p4 = por %p3438_p3, %p3437_p2 }
  0x2c   :  { %p3440_p5 = pnand %p3439_p4, %p3433_p1 }
  0x2e   :  { %3443 = shalt.err (!%p3440_p5)
}
  0x2f   :  { %37 = dma.hbm_to_vmem [thread:$0]  %s4121_s0, 256, %s32_s25, [#allocation3], %s3580_s30, %s3580_s30, %s3581_s14  }
  0x30   :  { %s3586_s15 = smov [#allocation7]   ;;  %s3587_s17 = smov [#allocation10]  }
  0x31   :  { %s55_s16 = sshll.u32 %s3586_s15, 4  ;;  %s79_s18 = sshll.u32 %s3587_s17, 4  ;;  %s56_s16 = int_to_ptr.vmem [resolvable:$true] %s55_s16  ;;  %s80_s18 = int_to_ptr.vmem [resolvable:$true] %s79_s18 }
  0x32   :  { %s3452_s5 = scalar_lea.vmem %s56_s16, 256  ;;  %p3457_p7 = scmp.lt.s32.totalorder %s56_s16, %s56_s16 }
  0x33   :  { %p3453_p6 = scmp.ne.s32.totalorder %s56_s16, %s3452_s5  ;;  %p3458_p8 = scmp.lt.s32.totalorder %s3452_s5, %s3452_s5 }
  0x35   :  { %p3459_p9 = por %p3458_p8, %p3457_p7 }
  0x37   :  { %p3460_p10 = pnand %p3459_p9, %p3453_p6 }
  0x39   :  { %3463 = shalt.err (!%p3460_p10)
}
  0x3a   :  { %61 = dma.hbm_to_vmem [thread:$0]  %s4123_s2, 256, %s56_s16, [#allocation6], %s3580_s30, %s3580_s30, %s3581_s14  }
  0x3b   :  { %s3472_s0 = scalar_lea.vmem %s80_s18, 512  ;;  %p3477_p12 = scmp.lt.s32.totalorder %s80_s18, %s80_s18 }
  0x3c   :  { %p3473_p11 = scmp.ne.s32.totalorder %s80_s18, %s3472_s0  ;;  %p3478_p13 = scmp.lt.s32.totalorder %s3472_s0, %s3472_s0 }
  0x3e   :  { %p3479_p0 = por %p3478_p13, %p3477_p12 }
  0x40   :  { %p3480_p1 = pnand %p3479_p0, %p3473_p11 }
  0x42   :  { %3483 = shalt.err (!%p3480_p1)
}
  0x43   :  { %85 = dma.hbm_to_vmem [thread:$0]  %s4125_s4, 512, %s80_s18, [#allocation9], %s3580_s30, %s3580_s30, %s3581_s14  }
  0x44   :  { %s3588_s23 = smov [#allocation13]   ;;  %s3589_s25 = smov [#allocation14]  }
  0x45   :  { %s103_s24 = sshll.u32 %s3588_s23, 4  ;;  %s115_s1 = sshll.u32 %s3589_s25, 4  ;;  %s104_s24 = int_to_ptr.vmem [resolvable:$true] %s103_s24  ;;  %s116_s1 = int_to_ptr.vmem [resolvable:$true] %s115_s1 }
  0x46   :  { %s3492_s2 = scalar_lea.vmem %s104_s24, 512  ;;  %p3497_p3 = scmp.lt.s32.totalorder %s104_s24, %s104_s24 }
  0x47   :  { %p3493_p2 = scmp.ne.s32.totalorder %s104_s24, %s3492_s2  ;;  %p3498_p4 = scmp.lt.s32.totalorder %s3492_s2, %s3492_s2 }
  0x49   :  { %p3499_p5 = por %p3498_p4, %p3497_p3 }
  0x4b   :  { %p3500_p6 = pnand %p3499_p5, %p3493_p2 }
  0x4d   :  { %3503 = shalt.err (!%p3500_p6)
}
  0x4e   :  { %109 = dma.hbm_to_vmem [thread:$0]  %s4127_s6, 512, %s104_s24, [#allocation12], %s3580_s30, %s3580_s30, %s3581_s14  }
  0x4f   :  { %s3512_s4 = scalar_lea.vmem %s116_s1, 512  ;;  %p3517_p8 = scmp.lt.s32.totalorder %s116_s1, %s116_s1 }
  0x50   :  { %p3513_p7 = scmp.ne.s32.totalorder %s116_s1, %s3512_s4  ;;  %p3518_p9 = scmp.lt.s32.totalorder %s3512_s4, %s3512_s4 }
  0x52   :  { %p3519_p10 = por %p3518_p9, %p3517_p8 }
  0x54   :  { %p3520_p11 = pnand %p3519_p10, %p3513_p7 }
  0x56   :  { %3523 = shalt.err (!%p3520_p11)
}
  0x57   :  { %121 = dma.hbm_to_vmem [thread:$0]  %s4128_s7, 512, %s116_s1, [#allocation15], %s3580_s30, %s3580_s30, %s3581_s14  }
  0x58   :  { %3564 = dma.done.wait [#allocation3], 256  }
  0x59   :  { %3565 = vsyncadd [#allocation3], 4294967040 }
  0x5a   :  { %3566 = dma.done.wait [#allocation6], 512  }
  0x5b   :  { %3567 = vsyncadd [#allocation6], 4294966784 }
  0x5c   :  { %3568 = dma.done.wait [#allocation9], 640  }
  0x5d   :  { %3569 = vsyncadd [#allocation9], 4294966656 }
  0x5e   :  { %3570 = dma.done.wait [#allocation12], 1024  }
  0x5f   :  { %3571 = vsyncadd [#allocation12], 4294966272 }
  0x60   :  { %3572 = dma.done.wait [#allocation15], 512  }
  0x61   :  { %3573 = vsyncadd [#allocation15], 4294966784  ;;  %v256_v0 = vld [vmem:[#allocation11 + $0x18] sm:$0xff]  ;;  %v255_v2 = vld [vmem:[#allocation11 + $0x10] sm:$0xff]  ;;  %vm171_vm0 = vcmask 261120   ;;  %s3590_s16 = smov 104   ;;  %v462_v31 = vlaneseq }
  0x62   :  { %v163_v1 = vld [vmem:[#allocation10 + $0x18] sm:$0xff]  ;;  %3196 = vmatprep.subr.mxu1 %v256_v0  ;;  %v162_v3 = vld [vmem:[#allocation10 + $0x10] sm:$0xff]  ;;  %v254_v4 = vld [vmem:[#allocation11 + $0x8] sm:$0xff]  ;;  %s3591_s17 = smov 120   ;;  %v3593_v22 = vmov 0.0   ;;  %vm3594_vm1 = vmmov 0  }
  0x63   :  { %3185 = vmatprep.subr.mxu0 %v163_v1  ;;  %3197 = vmatpush3.msra.mxu1 %v256_v0  ;;  %v161_v5 = vld [vmem:[#allocation10 + $0x8] sm:$0xff]  ;;  %v253_v6 = vld [vmem:[#allocation11] sm:$0xff]  ;;  %v156_v7 = vld [vmem:[#allocation5] sm:$0xff]  ;;  %v3595_v29 = vmov 1983009808   ;;  %v463_v35 = vshrl.u32 %v462_v31, 7 }
  0x64   :  { %3186 = vmatpush3.msra.mxu0 %v163_v1  ;;  %3198 = vmatprep.subr.mxu1 %v255_v2  ;;  %v160_v8 = vld [vmem:[#allocation10] sm:$0xff]  ;;  %v154_v10 = vld [vmem:[#allocation2] sm:$0xff]  ;;  %v155_v11 = vld [vmem:[#allocation2 + $0x8] sm:$0xff]  ;;  %v460_v30 = vunpack.c.l.s4 %v3595_v29  ;;  %v3596_v32 = vmov 1934713408   ;;  %vm1313_vm2 = vcmask 64512  }
  0x65   :  { %3187 = vmatprep.subr.mxu0 %v162_v3  ;;  %3199 = vmatpush3.msra.mxu1 %v255_v2  ;;  %v157_v9 = vld [vmem:[#allocation5 + $0x8] sm:$0xff]  ;;  %v3076_v13 = vld [vmem:[%s4130_s9] ss:$0 sm:$0xff]  ;;  %s3592_s9 = smov 112   ;;  %v348_v23 = vld [vmem:[#allocation13 + $0x18] sm:$0xff]  ;;  %v492_v33 = vunpack.c.l.s4 %v3596_v32  ;;  %s3598_s5 = smov 24  }
  0x66   :  { %3188 = vmatpush3.msra.mxu0 %v162_v3  ;;  %3200 = vmatprep.subr.mxu1 %v254_v4  ;;  %v3073_v17 = vld [vmem:[%s4129_s8] ss:$0 sm:$0xff]  ;;  %v347_v24 = vld [vmem:[#allocation13 + $0x10] sm:$0xff]  ;;  %v345_v26 = vld [vmem:[#allocation13] sm:$0xff]  ;;  %v461_v34 = vunpack.c.0.s8 %v460_v30  ;;  %vm2936_vm3 = vcmask 130048   ;;  %vm2939_vm4 = vcmask 195584  }
  0x67   :  { %3189 = vmatprep.subr.mxu0 %v161_v5  ;;  %3201 = vmatpush3.msra.mxu1 %v254_v4  ;;  %v346_v25 = vld [vmem:[#allocation13 + $0x8] sm:$0xff]  ;;  %v159_v28 = vld [vmem:[#allocation7 + $0x8] sm:$0xff]  ;;  %v493_v38 = vunpack.c.0.s8 %v492_v33  ;;  %s3599_s19 = smov [#allocation17]  }
  0x68   :  { %3190 = vmatpush3.msra.mxu0 %v161_v5  ;;  %3202 = vmatprep.subr.mxu1 %v253_v6  ;;  %v158_v27 = vld [vmem:[#allocation7] sm:$0xff]  ;;  %v3766_v39 = vsub.s32 %v461_v34, %v463_v35  ;;  %s3053_s20 = sshll.u32 %s3599_s19, 4  ;;  %s3054_s20 = int_to_ptr.vmem [resolvable:$true] %s3053_s20 }
  0x69   :  { %3204 = vmatprep.mubr.msk.f32.mxu1 %vm171_vm0, %v156_v7  ;;  %3203 = vmatpush3.msra.mxu1 %v253_v6  ;;  %v3770_v46 = vsub.s32 %v493_v38, %v463_v35  ;;  %s3524_s0 = scalar_lea.vmem %s3054_s20, 1024  ;;  %p3529_p13 = scmp.lt.s32.totalorder %s3054_s20, %s3054_s20 }
  0x6a   :  { %3191 = vmatprep.subr.mxu0 %v160_v8  ;;  %3205 = vmatmul.mubr.msk.f32.vlgmr.msra.gmra.mxu1 %vm171_vm0, %v157_v9  ;;  %p3525_p12 = scmp.ne.s32.totalorder %s3054_s20, %s3524_s0  ;;  %p3530_p0 = scmp.lt.s32.totalorder %s3524_s0, %s3524_s0 }
  0x6b   :  { %3192 = vmatpush3.msra.mxu0 %v160_v8  ;;  %3193 = vmatprep.mubr.msk.f32.mxu0 %vm171_vm0, %v154_v10 }
  0x6c   :  { %3194 = vmatmul.mubr.msk.f32.vlgmr.msra.gmra.mxu0 %vm171_vm0, %v155_v11  ;;  %3218 = vmatprep.subr.mxu1 %v3593_v22  ;;  %p3531_p1 = por %p3530_p0, %p3529_p13 }
  0x6d   :  { %3207 = vmatprep.subr.mxu0 %v348_v23  ;;  %3220 = vmatprep.mubr.msk.f32.mxu1 %vm3594_vm1, %v3593_v22 }
  0x6e   :  { %3208 = vmatpush3.msra.mxu0 %v348_v23  ;;  %3215 = vmatprep.mubr.msk.f32.mxu0 %vm171_vm0, %v158_v27  ;;  %p3532_p2 = pnand %p3531_p1, %p3525_p12 }
  0x6f   :  { %3209 = vmatprep.subr.mxu0 %v347_v24 }
  0x70   :  { %3210 = vmatpush3.msra.mxu0 %v347_v24 }
  0x71   :  { %3211 = vmatprep.subr.mxu0 %v346_v25 }
  0x72   :  { %3212 = vmatpush3.msra.mxu0 %v346_v25 }
  0x73   :  { %3213 = vmatprep.subr.mxu0 %v345_v26 }
  0x74   :  { %3214 = vmatpush3.msra.mxu0 %v345_v26 }
  0x75   :  { %3238 = vmatprep.subr.mxu0 %v3593_v22  ;;  %3216 = vmatmul.mubr.msk.f32.vlgmr.msra.gmra.mxu0 %vm171_vm0, %v159_v28 }
  0x76   :  { %3240 = vmatprep.mubr.msk.f32.mxu0 %vm3594_vm1, %v3593_v22 }
 0x12a   :  { %v3206_v12 = vpop.f32.mrf.mxu1 }
 0x12b   :  { %v3742_v20 = vadd.f32 %v3206_v12, %v3076_v13 }
 0x12c   :  { %v3195_v14 = vpop.f32.mrf.mxu0  ;;  %v336_v15 = vpop.f32.mrf.mxu1 }
 0x12d   :  { %v3723_v16 = vadd.f32 %v3076_v13, %v336_v15  ;;  %v3748_v21 = vadd.f32 %v3195_v14, %v3073_v17 }
 0x12e   :  { %v244_v18 = vpop.f32.mrf.mxu0 }
 0x12f   :  { %743 = vrot.lane.b32.xlu1 %v3723_v16, %s3590_s16  ;;  %731 = vrot.lane.b32.xlu0 %v3723_v16, %s3591_s17  ;;  %v3732_v19 = vadd.f32 %v3073_v17, %v244_v18 }
 0x133   :  { %737 = vrot.lane.b32.xlu0 %v3723_v16, %s3592_s9  ;;  %439 = vrot.lane.b32.xlu1 %v3732_v19, %s3591_s17 }
 0x137   :  { %445 = vrot.lane.b32.xlu0 %v3732_v19, %s3592_s9  ;;  %451 = vrot.lane.b32.xlu1 %v3732_v19, %s3590_s16 }
 0x13b   :  { %733 = vrot.lane.b32.xlu0 %v3742_v20, %s3591_s17  ;;  %739 = vrot.lane.b32.xlu1 %v3742_v20, %s3592_s9 }
 0x13f   :  { %745 = vrot.lane.b32.xlu0 %v3742_v20, %s3590_s16  ;;  %441 = vrot.lane.b32.xlu1 %v3748_v21, %s3591_s17 }
 0x143   :  { %447 = vrot.lane.b32.xlu0 %v3748_v21, %s3592_s9  ;;  %453 = vrot.lane.b32.xlu1 %v3748_v21, %s3590_s16 }
 0x1a1   :  { %v744_v36 = vpop.permute.xlu1 %743  ;;  %v732_v37 = vpop.permute.xlu0 %731 }
 0x1a2   :  { %v765_v40 = vcombine.low %v732_v37, %v744_v36  ;;  %v766_v41 = vcombine.high %v732_v37, %v744_v36 }
 0x1a4   :  { %v773_v47 = vrot.slane %v765_v40, %v3766_v39  ;;  %v780_v48 = vrot.slane %v766_v41, %v3766_v39 }
 0x1a5   :  { %v738_v42 = vpop.permute.xlu0 %737  ;;  %v440_v43 = vpop.permute.xlu1 %439 }
 0x1a6   :  { %v749_v44 = vcombine.low %v3723_v16, %v738_v42  ;;  %v750_v45 = vcombine.high %v3723_v16, %v738_v42 }
 0x1a8   :  { %v757_v49 = vrot.slane %v749_v44, %v3766_v39  ;;  %v764_v50 = vrot.slane %v750_v45, %v3766_v39 }
 0x1a9   :  { %v446_v51 = vpop.permute.xlu0 %445  ;;  %v452_v52 = vpop.permute.xlu1 %451 }
 0x1aa   :  { %v781_v53 = vcombine.low %v757_v49, %v773_v47  ;;  %v782_v54 = vcombine.high %v757_v49, %v773_v47  ;;  %v797_v55 = vcombine.low %v764_v50, %v780_v48  ;;  %v798_v56 = vcombine.high %v764_v50, %v780_v48 }
 0x1ab   :  { %v457_v57 = vcombine.low %v3732_v19, %v446_v51  ;;  %v458_v58 = vcombine.high %v3732_v19, %v446_v51  ;;  %v473_v59 = vcombine.low %v440_v43, %v452_v52  ;;  %v474_v60 = vcombine.high %v440_v43, %v452_v52 }
 0x1ac   :  { %v789_v61 = vrot.slane %v781_v53, %v3770_v46  ;;  %v796_v62 = vrot.slane %v782_v54, %v3770_v46  ;;  %v805_v63 = vrot.slane %v797_v55, %v3770_v46  ;;  %v812_v0 = vrot.slane %v798_v56, %v3770_v46 }
 0x1ad   :  { %v465_v1 = vrot.slane %v457_v57, %v3766_v39  ;;  %v472_v2 = vrot.slane %v458_v58, %v3766_v39  ;;  %v481_v3 = vrot.slane %v473_v59, %v3766_v39  ;;  %v488_v4 = vrot.slane %v474_v60, %v3766_v39  ;;  %v734_v5 = vpop.permute.xlu0 %733  ;;  %v740_v6 = vpop.permute.xlu1 %739 }
 0x1ae   :  { %v885_v7 = vcombine.low %v789_v61, %v796_v62  ;;  %v3086_v8 = vcombine.high %v789_v61, %v796_v62  ;;  %v901_v9 = vcombine.low %v805_v63, %v812_v0  ;;  %v3087_v10 = vcombine.high %v805_v63, %v812_v0 }
 0x1af   :  { %v489_v11 = vcombine.low %v465_v1, %v481_v3  ;;  %v490_v12 = vcombine.high %v465_v1, %v481_v3  ;;  %v505_v13 = vcombine.low %v472_v2, %v488_v4  ;;  %v506_v14 = vcombine.high %v472_v2, %v488_v4 }
 0x1b0   :  { %v3791_v24 = vrot.slane %v885_v7, %v3766_v39  ;;  %v3794_v25 = vrot.slane %v3086_v8, %v3766_v39  ;;  %v3797_v26 = vrot.slane %v901_v9, %v3766_v39  ;;  %v3800_v27 = vrot.slane %v3087_v10, %v3766_v39 }
 0x1b1   :  { %v497_v15 = vrot.slane %v489_v11, %v3770_v46  ;;  %v504_v16 = vrot.slane %v490_v12, %v3770_v46  ;;  %v513_v17 = vrot.slane %v505_v13, %v3770_v46  ;;  %v520_v18 = vrot.slane %v506_v14, %v3770_v46  ;;  %v746_v19 = vpop.permute.xlu0 %745  ;;  %v442_v23 = vpop.permute.xlu1 %441 }
 0x1b2   :  { %v817_v32 = vcombine.low %v3742_v20, %v740_v6  ;;  %v818_v33 = vcombine.high %v3742_v20, %v740_v6  ;;  %v833_v34 = vcombine.low %v734_v5, %v746_v19  ;;  %v834_v35 = vcombine.high %v734_v5, %v746_v19 }
 0x1b3   :  { %v593_v28 = vcombine.low %v497_v15, %v504_v16  ;;  %v3082_v29 = vcombine.high %v497_v15, %v504_v16  ;;  %v609_v30 = vcombine.low %v513_v17, %v520_v18  ;;  %v3083_v31 = vcombine.high %v513_v17, %v520_v18 }
 0x1b4   :  { %v825_v41 = vrot.slane %v817_v32, %v3766_v39  ;;  %v832_v42 = vrot.slane %v818_v33, %v3766_v39  ;;  %v841_v20 = vrot.slane %v833_v34, %v3766_v39  ;;  %v848_v43 = vrot.slane %v834_v35, %v3766_v39 }
 0x1b5   :  { %v3805_v36 = vrot.slane %v593_v28, %v3766_v39  ;;  %v3808_v37 = vrot.slane %v3082_v29, %v3766_v39  ;;  %v3811_v38 = vrot.slane %v609_v30, %v3766_v39  ;;  %v3814_v40 = vrot.slane %v3083_v31, %v3766_v39  ;;  %v448_v44 = vpop.permute.xlu0 %447  ;;  %v454_v45 = vpop.permute.xlu1 %453 }
 0x1b6   :  { %v917_v47 = vcombine.low %v3791_v24, %v3794_v25  ;;  %v933_v48 = vcombine.low %v3797_v26, %v3800_v27  ;;  %v849_v51 = vcombine.low %v825_v41, %v841_v20  ;;  %v850_v52 = vcombine.high %v825_v41, %v841_v20 }
 0x1b7   :  { %v625_v49 = vcombine.low %v3805_v36, %v3808_v37  ;;  %v641_v50 = vcombine.low %v3811_v38, %v3814_v40  ;;  %v865_v53 = vcombine.low %v832_v42, %v848_v43  ;;  %v866_v54 = vcombine.high %v832_v42, %v848_v43 }
 0x1b8   :  { %v525_v55 = vcombine.low %v3748_v21, %v448_v44  ;;  %v526_v56 = vcombine.high %v3748_v21, %v448_v44  ;;  %v541_v57 = vcombine.low %v442_v23, %v454_v45  ;;  %v542_v58 = vcombine.high %v442_v23, %v454_v45 }
 0x1b9   :  { %v857_v59 = vrot.slane %v849_v51, %v3770_v46  ;;  %v864_v60 = vrot.slane %v850_v52, %v3770_v46  ;;  %v873_v61 = vrot.slane %v865_v53, %v3770_v46  ;;  %v880_v62 = vrot.slane %v866_v54, %v3770_v46 }
 0x1ba   :  { %v533_v63 = vrot.slane %v525_v55, %v3766_v39  ;;  %v540_v0 = vrot.slane %v526_v56, %v3766_v39  ;;  %v549_v1 = vrot.slane %v541_v57, %v3766_v39  ;;  %v556_v2 = vrot.slane %v542_v58, %v3766_v39 }
 0x1bb   :  { %v953_v3 = vcombine.low %v857_v59, %v864_v60  ;;  %v3088_v21 = vcombine.high %v857_v59, %v864_v60  ;;  %v969_v4 = vcombine.low %v873_v61, %v880_v62  ;;  %v3089_v5 = vcombine.high %v873_v61, %v880_v62 }
 0x1bc   :  { %v557_v6 = vcombine.low %v533_v63, %v549_v1  ;;  %v558_v7 = vcombine.high %v533_v63, %v549_v1  ;;  %v573_v8 = vcombine.low %v540_v0, %v556_v2  ;;  %v574_v9 = vcombine.high %v540_v0, %v556_v2 }
 0x1bd   :  { %v960_v10 = vrot.slane %v953_v3, %v3766_v39  ;;  %v968_v11 = vrot.slane %v3088_v21, %v3766_v39  ;;  %v976_v12 = vrot.slane %v969_v4, %v3766_v39  ;;  %v984_v13 = vrot.slane %v3089_v5, %v3766_v39 }
 0x1be   :  { %v565_v14 = vrot.slane %v557_v6, %v3770_v46  ;;  %v572_v15 = vrot.slane %v558_v7, %v3770_v46  ;;  %v581_v16 = vrot.slane %v573_v8, %v3770_v46  ;;  %v588_v17 = vrot.slane %v574_v9, %v3770_v46  ;;  %v3126_v9 = vld [vmem:[#allocation8] sm:$0xff]  }
 0x1bf   :  { %v985_v18 = vcombine.low %v960_v10, %v968_v11  ;;  %v1001_v19 = vcombine.low %v976_v12, %v984_v13  ;;  %v925_v31 = vrot.slane %v917_v47, %v3770_v46  ;;  %v941_v32 = vrot.slane %v933_v48, %v3770_v46 }
 0x1c0   :  { %v661_v23 = vcombine.low %v565_v14, %v572_v15  ;;  %v3084_v28 = vcombine.high %v565_v14, %v572_v15  ;;  %v677_v29 = vcombine.low %v581_v16, %v588_v17  ;;  %v3085_v30 = vcombine.high %v581_v16, %v588_v17 }
 0x1c1   :  { %v633_v33 = vrot.slane %v625_v49, %v3770_v46  ;;  %v649_v34 = vrot.slane %v641_v50, %v3770_v46  ;;  %v918_v43 = vcombine.high %v3791_v24, %v3794_v25  ;;  %v934_v44 = vcombine.high %v3797_v26, %v3800_v27 }
 0x1c2   :  { %v668_v35 = vrot.slane %v661_v23, %v3766_v39  ;;  %v676_v41 = vrot.slane %v3084_v28, %v3766_v39  ;;  %v684_v42 = vrot.slane %v677_v29, %v3766_v39  ;;  %v692_v20 = vrot.slane %v3085_v30, %v3766_v39 }
 0x1c3   :  { %v949_v45 = vcombine.low %v925_v31, %v941_v32  ;;  %v657_v49 = vcombine.low %v633_v33, %v649_v34  ;;  %v626_v50 = vcombine.high %v3805_v36, %v3808_v37  ;;  %v642_v51 = vcombine.high %v3811_v38, %v3814_v40 }
 0x1c4   :  { %v693_v47 = vcombine.low %v668_v35, %v676_v41  ;;  %v709_v48 = vcombine.low %v684_v42, %v692_v20  ;;  %v986_v52 = vcombine.high %v960_v10, %v968_v11  ;;  %v1002_v53 = vcombine.high %v976_v12, %v984_v13  ;;  %v3217_v12 = vpop.f32.mrf.mxu0 }
 0x1c5   :  { %3219 = vmatpush3.xpose.msk.msra.mxu1 %vm1313_vm2, %v949_v45  ;;  %v993_v24 = vrot.slane %v985_v18, %v3770_v46  ;;  %v1009_v25 = vrot.slane %v1001_v19, %v3770_v46  ;;  %v950_v54 = vcombine.high %v925_v31, %v941_v32  ;;  %v932_v36 = vrot.slane %v918_v43, %v3770_v46 }
 0x1c6   :  { %3223 = vmatprep.subr.mxu1 %v3593_v22  ;;  %v701_v26 = vrot.slane %v693_v47, %v3770_v46  ;;  %v717_v27 = vrot.slane %v709_v48, %v3770_v46  ;;  %v948_v37 = vrot.slane %v934_v44, %v3770_v46  ;;  %v694_v38 = vcombine.high %v668_v35, %v676_v41  ;;  %v428_v18 = vpop.f32.mrf.mxu0 }
 0x1c7   :  { %v710_v40 = vcombine.high %v684_v42, %v692_v20  ;;  %v1017_v55 = vcombine.low %v993_v24, %v1009_v25  ;;  %v658_v56 = vcombine.high %v633_v33, %v649_v34  ;;  %v1000_v57 = vrot.slane %v986_v52, %v3770_v46 }
 0x1c8   :  { %3221 = vmatmul.mubr.msk.f32.vlgmr.msra.gmra.mxu1 %vm1313_vm2, %v657_v49  ;;  %v1016_v58 = vrot.slane %v1002_v53, %v3770_v46  ;;  %v640_v59 = vrot.slane %v626_v50, %v3770_v46  ;;  %v656_v60 = vrot.slane %v642_v51, %v3770_v46  ;;  %v725_v61 = vcombine.low %v701_v26, %v717_v27 }
 0x1c9   :  { %3224 = vmatpush3.xpose.msk.msra.mxu1 %vm1313_vm2, %v950_v54  ;;  %3225 = vmatprep.mubr.msk.f32.mxu1 %vm3594_vm1, %v3593_v22  ;;  %v951_v62 = vcombine.low %v932_v36, %v948_v37  ;;  %v708_v63 = vrot.slane %v694_v38, %v3770_v46  ;;  %v724_v0 = vrot.slane %v710_v40, %v3770_v46  ;;  %v3127_v10 = vunpack.c.l.bf16 %v3126_v9  ;;  %v3079_v54 = vld [vmem:[%s4131_s10] ss:$0 sm:$0xff]  ;;  %s3597_s10 = smov 16  }
 0x1ca   :  { %3228 = vmatprep.subr.mxu1 %v3593_v22  ;;  %3239 = vmatpush3.xpose.msk.msra.mxu0 %vm1313_vm2, %v1017_v55  ;;  %v1019_v1 = vcombine.low %v1000_v57, %v1016_v58  ;;  %v659_v2 = vcombine.low %v640_v59, %v656_v60  ;;  %v952_v3 = vcombine.high %v932_v36, %v948_v37  ;;  %v3128_v16 = vunpack.c.h.bf16 %v3126_v9 }
 0x1cb   :  { %3248 = vmatprep.subr.mxu0 %v3593_v22  ;;  %v727_v21 = vcombine.low %v708_v63, %v724_v0  ;;  %v660_v4 = vcombine.high %v640_v59, %v656_v60  ;;  %v1018_v5 = vcombine.high %v993_v24, %v1009_v25  ;;  %v726_v6 = vcombine.high %v701_v26, %v717_v27 }
 0x1cc   :  { %3226 = vmatmul.mubr.msk.f32.vlgmr.msra.gmra.mxu1 %vm1313_vm2, %v658_v56  ;;  %v1020_v7 = vcombine.high %v1000_v57, %v1016_v58  ;;  %v728_v8 = vcombine.high %v708_v63, %v724_v0  ;;  %v429_v36 = vadd.f32 %v3079_v54, %v428_v18  ;;  %v3927_v37 = vadd.f32 %v3217_v12, %v3079_v54 }
 0x1cd   :  { %3229 = vmatpush3.xpose.msk.msra.mxu1 %vm1313_vm2, %v951_v62  ;;  %3230 = vmatprep.mubr.msk.f32.mxu1 %vm3594_vm1, %v3593_v22 }
 0x1ce   :  { %3233 = vmatprep.subr.mxu1 %v3593_v22  ;;  %3241 = vmatmul.mubr.msk.f32.vlgmr.msra.gmra.mxu0 %vm1313_vm2, %v725_v61 }
 0x1cf   :  { %3249 = vmatpush3.xpose.msk.msra.mxu0 %vm1313_vm2, %v1019_v1  ;;  %3250 = vmatprep.mubr.msk.f32.mxu0 %vm3594_vm1, %v3593_v22 }
 0x1d0   :  { %3231 = vmatmul.mubr.msk.f32.vlgmr.msra.gmra.mxu1 %vm1313_vm2, %v659_v2  ;;  %3258 = vmatprep.subr.mxu0 %v3593_v22 }
 0x1d1   :  { %3234 = vmatpush3.xpose.msk.msra.mxu1 %vm1313_vm2, %v952_v3  ;;  %3235 = vmatprep.mubr.msk.f32.mxu1 %vm3594_vm1, %v3593_v22 }
 0x1d2   :  { %3243 = vmatprep.subr.mxu1 %v3593_v22  ;;  %3251 = vmatmul.mubr.msk.f32.vlgmr.msra.gmra.mxu0 %vm1313_vm2, %v727_v21 }
 0x1d3   :  { %3260 = vmatprep.mubr.msk.f32.mxu0 %vm3594_vm1, %v3593_v22 }
 0x1d4   :  { %3236 = vmatmul.mubr.msk.f32.vlgmr.msra.gmra.mxu1 %vm1313_vm2, %v660_v4 }
 0x1d5   :  { %3244 = vmatpush3.xpose.msk.msra.mxu1 %vm1313_vm2, %v1018_v5  ;;  %3245 = vmatprep.mubr.msk.f32.mxu1 %vm3594_vm1, %v3593_v22 }
 0x1d6   :  { %3253 = vmatprep.subr.mxu1 %v3593_v22 }
 0x1d8   :  { %3246 = vmatmul.mubr.msk.f32.vlgmr.msra.gmra.mxu1 %vm1313_vm2, %v726_v6 }
 0x1d9   :  { %3254 = vmatpush3.xpose.msk.msra.mxu1 %vm1313_vm2, %v1020_v7  ;;  %3255 = vmatprep.mubr.msk.f32.mxu1 %vm3594_vm1, %v3593_v22 }
 0x1da   :  { %3263 = vmatprep.subr.mxu1 %v3593_v22 }
 0x1dc   :  { %3256 = vmatmul.mubr.msk.f32.vlgmr.msra.gmra.mxu1 %vm1313_vm2, %v728_v8 }
 0x1dd   :  { %3265 = vmatprep.mubr.msk.f32.mxu1 %vm3594_vm1, %v3593_v22 }
 0x288   :  { %v1386_v11 = vpop.f32.mrf.mxu1 }
 0x289   :  { %v1926_v13 = vadd.f32 %v3127_v10, %v1386_v11 }
 0x28a   :  { %v3222_v14 = vpop.f32.mrf.mxu1 }
 0x28b   :  { %v1934_v15 = vsel %vm1313_vm2, %v1926_v13, -inf }
 0x28c   :  { %1935 = vmax.xlane.f32.xlu0 %v1934_v15  ;;  %v1462_v17 = vpop.f32.mrf.mxu1 }
 0x28d   :  { %v1927_v31 = vadd.f32 %v3127_v10, %v1462_v17 }
 0x28e   :  { %v3227_v19 = vpop.f32.mrf.mxu1  ;;  %v1690_v23 = vpop.f32.mrf.mxu0 }
 0x28f   :  { %v1930_v28 = vadd.f32 %v3128_v16, %v1690_v23  ;;  %v1937_v45 = vsel %vm1313_vm2, %v1927_v31, -inf }
 0x290   :  { %v1538_v29 = vpop.f32.mrf.mxu1  ;;  %v3242_v30 = vpop.f32.mrf.mxu0 }
 0x291   :  { %v1928_v32 = vadd.f32 %v3127_v10, %v1538_v29  ;;  %v1946_v33 = vsel %vm1313_vm2, %v1930_v28, -inf }
 0x292   :  { %v3232_v34 = vpop.f32.mrf.mxu1  ;;  %1947 = vmax.xlane.f32.xlu1 %v1946_v33  ;;  %v1842_v35 = vpop.f32.mrf.mxu0 }
 0x293   :  { %v1940_v41 = vsel %vm1313_vm2, %v1928_v32, -inf  ;;  %v1932_v44 = vadd.f32 %v3128_v16, %v1842_v35 }
 0x294   :  { %1941 = vmax.xlane.f32.xlu0 %v1940_v41  ;;  %v1614_v42 = vpop.f32.mrf.mxu1  ;;  %v3252_v20 = vpop.f32.mrf.mxu0 }
 0x295   :  { %v1929_v43 = vadd.f32 %v3127_v10, %v1614_v42  ;;  %v1952_v51 = vsel %vm1313_vm2, %v1932_v44, -inf }
 0x296   :  { %v3237_v47 = vpop.f32.mrf.mxu1  ;;  %1938 = vmax.xlane.f32.xlu1 %v1937_v45 }
 0x297   :  { %v1943_v48 = vsel %vm1313_vm2, %v1929_v43, -inf }
 0x298   :  { %1944 = vmax.xlane.f32.xlu0 %v1943_v48  ;;  %v1766_v49 = vpop.f32.mrf.mxu1 }
 0x299   :  { %v1931_v50 = vadd.f32 %v3128_v16, %v1766_v49 }
 0x29a   :  { %v3247_v52 = vpop.f32.mrf.mxu1  ;;  %1953 = vmax.xlane.f32.xlu1 %v1952_v51 }
 0x29b   :  { %v1949_v53 = vsel %vm1313_vm2, %v1931_v50, -inf }
 0x29c   :  { %1950 = vmax.xlane.f32.xlu0 %v1949_v53  ;;  %v1918_v24 = vpop.f32.mrf.mxu1 }
 0x29d   :  { %v1933_v25 = vadd.f32 %v3128_v16, %v1918_v24 }
 0x29e   :  { %v3257_v26 = vpop.f32.mrf.mxu1 }
 0x29f   :  { %v1955_v27 = vsel %vm1313_vm2, %v1933_v25, -inf }
 0x2a0   :  { %1956 = vmax.xlane.f32.xlu0 %v1955_v27 }
 0x2ab   :  { %1023 = vrot.lane.b32.xlu1 %v429_v36, %s3591_s17 }
 0x2af   :  { %1035 = vrot.lane.b32.xlu1 %v429_v36, %s3590_s16 }
 0x2b3   :  { %1025 = vrot.lane.b32.xlu1 %v3927_v37, %s3591_s17 }
 0x2b6   :  { %1029 = vrot.lane.b32.xlu0 %v429_v36, %s3592_s9 }
 0x315   :  { %v1936_v38 = vpop.xlane.xlu0 %1935 }
 0x316   :  { %v1958_v40 = vsub.f32 %v1926_v13, %v1936_v38 }
 0x318   :  { %v1966_v59 = vmul.f32 1.442695, %v1958_v40 }
 0x31b   :  { %v1948_v55 = vpop.xlane.xlu1 %1947 }
 0x31c   :  { %v1962_v56 = vsub.f32 %v1930_v28, %v1948_v55 }
 0x31d   :  { %v1942_v57 = vpop.xlane.xlu0 %1941 }
 0x31e   :  { %v1974_v58 = vmul.f32 1.442695, %v1962_v56  ;;  %v1960_v2 = vsub.f32 %v1928_v32, %v1942_v57 }
 0x31f   :  { %v1939_v60 = vpop.xlane.xlu1 %1938 }
 0x320   :  { %3332 = vpow2.f32 %v1974_v58  ;;  %v1959_v61 = vsub.f32 %v1927_v31, %v1939_v60  ;;  %v1970_v8 = vmul.f32 1.442695, %v1960_v2 }
 0x321   :  { %v1945_v62 = vpop.xlane.xlu0 %1944  ;;  %3334 = vpow2.f32 %v1966_v59 }
 0x322   :  { %v1961_v63 = vsub.f32 %v1929_v43, %v1945_v62  ;;  %v1968_v0 = vmul.f32 1.442695, %v1959_v61 }
 0x323   :  { %v1954_v1 = vpop.xlane.xlu1 %1953 }
 0x324   :  { %v1972_v3 = vmul.f32 1.442695, %v1961_v63  ;;  %3336 = vpow2.f32 %v1968_v0  ;;  %v1964_v21 = vsub.f32 %v1932_v44, %v1954_v1 }
 0x325   :  { %v1951_v4 = vpop.xlane.xlu0 %1950 }
 0x326   :  { %v1963_v5 = vsub.f32 %v1931_v50, %v1951_v4  ;;  %v1978_v6 = vmul.f32 1.442695, %v1964_v21  ;;  %3338 = vpow2.f32 %v1972_v3 }
 0x327   :  { %v1024_v7 = vpop.permute.xlu1 %1023 }
 0x328   :  { %v1976_v9 = vmul.f32 1.442695, %v1963_v5  ;;  %3340 = vpow2.f32 %v1978_v6 }
 0x329   :  { %v1957_v10 = vpop.xlane.xlu0 %1956 }
 0x32a   :  { %v1965_v11 = vsub.f32 %v1933_v25, %v1957_v10  ;;  %3342 = vpow2.f32 %v1976_v9 }
 0x32b   :  { %v1036_v12 = vpop.permute.xlu1 %1035  ;;  %3344 = vpow2.f32 %v1970_v8 }
 0x32c   :  { %v1980_v13 = vmul.f32 1.442695, %v1965_v11  ;;  %v1057_v14 = vcombine.low %v1024_v7, %v1036_v12  ;;  %v1058_v15 = vcombine.high %v1024_v7, %v1036_v12 }
 0x32d   :  { %v3932_v16 = vpop.eup %3332  ;;  %v1030_v17 = vpop.permute.xlu0 %1029 }
 0x32e   :  { %v1041_v18 = vcombine.low %v429_v36, %v1030_v17  ;;  %v1042_v19 = vcombine.high %v429_v36, %v1030_v17  ;;  %v1065_v23 = vrot.slane %v1057_v14, %v3766_v39  ;;  %v1072_v28 = vrot.slane %v1058_v15, %v3766_v39  ;;  %v3938_v30 = vpop.eup %3334 }
 0x32f   :  { %v1994_v29 = vsel %vm1313_vm2, %v3932_v16, 0.0  ;;  %3346 = vpow2.f32 %v1980_v13  ;;  %v1982_v43 = vsel %vm1313_vm2, %v3938_v30, 0.0  ;;  %v1026_v7 = vpop.permute.xlu1 %1025 }
 0x330   :  { %v1049_v31 = vrot.slane %v1041_v18, %v3766_v39  ;;  %v1056_v32 = vrot.slane %v1042_v19, %v3766_v39  ;;  %1995 = vadd.xlane.f32.xlu1 %v1994_v29 }
 0x331   :  { %v3942_v33 = vpop.eup %3336 }
 0x332   :  { %v1073_v34 = vcombine.low %v1049_v31, %v1065_v23  ;;  %v1074_v35 = vcombine.high %v1049_v31, %v1065_v23  ;;  %v1089_v41 = vcombine.low %v1056_v32, %v1072_v28  ;;  %v1090_v42 = vcombine.high %v1056_v32, %v1072_v28 }
 0x333   :  { %v1985_v20 = vsel %vm1313_vm2, %v3942_v33, 0.0  ;;  %v3948_v44 = vpop.eup %3338 }
 0x334   :  { %v1081_v45 = vrot.slane %v1073_v34, %v3770_v46  ;;  %v1088_v47 = vrot.slane %v1074_v35, %v3770_v46  ;;  %v1097_v48 = vrot.slane %v1089_v41, %v3770_v46  ;;  %v1104_v49 = vrot.slane %v1090_v42, %v3770_v46  ;;  %1986 = vadd.xlane.f32.xlu0 %v1985_v20 }
 0x335   :  { %v3954_v50 = vpop.eup %3340  ;;  %1983 = vadd.xlane.f32.xlu1 %v1982_v43  ;;  %v1991_v25 = vsel %vm1313_vm2, %v3948_v44, 0.0 }
 0x336   :  { %v1177_v51 = vcombine.low %v1081_v45, %v1088_v47  ;;  %v3090_v52 = vcombine.high %v1081_v45, %v1088_v47  ;;  %v1193_v53 = vcombine.low %v1097_v48, %v1104_v49  ;;  %v3091_v24 = vcombine.high %v1097_v48, %v1104_v49 }
 0x337   :  { %v2000_v26 = vsel %vm1313_vm2, %v3954_v50, 0.0  ;;  %v3960_v27 = vpop.eup %3342 }
 0x338   :  { %v1184_v54 = vrot.slane %v1177_v51, %v3766_v39  ;;  %v1192_v36 = vrot.slane %v3090_v52, %v3766_v39  ;;  %v1200_v38 = vrot.slane %v1193_v53, %v3766_v39  ;;  %v1208_v40 = vrot.slane %v3091_v24, %v3766_v39  ;;  %1992 = vadd.xlane.f32.xlu0 %v1991_v25  ;;  %v3966_v55 = vpop.eup %3344 }
 0x339   :  { %2001 = vadd.xlane.f32.xlu1 %v2000_v26  ;;  %v1997_v60 = vsel %vm1313_vm2, %v3960_v27, 0.0  ;;  %v1988_v61 = vsel %vm1313_vm2, %v3966_v55, 0.0 }
 0x33a   :  { %v1209_v56 = vcombine.low %v1184_v54, %v1192_v36  ;;  %v1225_v57 = vcombine.low %v1200_v38, %v1208_v40  ;;  %v1210_v58 = vcombine.high %v1184_v54, %v1192_v36  ;;  %v1226_v59 = vcombine.high %v1200_v38, %v1208_v40 }
 0x33c   :  { %1998 = vadd.xlane.f32.xlu0 %v1997_v60  ;;  %v1217_v62 = vrot.slane %v1209_v56, %v3770_v46  ;;  %v1233_v63 = vrot.slane %v1225_v57, %v3770_v46  ;;  %v3975_v0 = vrot.slane %v1210_v58, %v3770_v46  ;;  %v3977_v1 = vpop.eup %3346  ;;  %v3980_v2 = vrot.slane %v1226_v59, %v3770_v46 }
 0x33d   :  { %1989 = vadd.xlane.f32.xlu1 %v1988_v61  ;;  %v2003_v6 = vsel %vm1313_vm2, %v3977_v1, 0.0 }
 0x33e   :  { %v1241_v3 = vcombine.low %v1217_v62, %v1233_v63  ;;  %v1242_v21 = vcombine.high %v1217_v62, %v1233_v63  ;;  %v1243_v4 = vcombine.low %v3975_v0, %v3980_v2  ;;  %v1244_v5 = vcombine.high %v3975_v0, %v3980_v2 }
 0x340   :  { %3259 = vmatpush3.msra.mxu0 %v1241_v3  ;;  %3264 = vmatpush3.msra.mxu1 %v1242_v21 }
 0x341   :  { %2004 = vadd.xlane.f32.xlu0 %v2003_v6  ;;  %3268 = vmatprep.subr.mxu0 %v3593_v22 }
 0x342   :  { %3273 = vmatprep.subr.mxu1 %v3593_v22 }
 0x34e   :  { %1037 = vrot.lane.b32.xlu1 %v3927_v37, %s3590_s16 }
 0x357   :  { %1031 = vrot.lane.b32.xlu0 %v3927_v37, %s3592_s9 }
 0x3b9   :  { %v1996_v8 = vpop.xlane.xlu1 %1995 }
 0x3ba   :  { %3348 = vrcp.f32 %v1996_v8 }
 0x3bd   :  { %v1987_v9 = vpop.xlane.xlu0 %1986 }
 0x3be   :  { %3350 = vrcp.f32 %v1987_v9  ;;  %v1984_v10 = vpop.xlane.xlu1 %1983 }
 0x3bf   :  { %3352 = vrcp.f32 %v1984_v10 }
 0x3c1   :  { %v1993_v11 = vpop.xlane.xlu0 %1992 }
 0x3c2   :  { %3354 = vrcp.f32 %v1993_v11  ;;  %v2002_v12 = vpop.xlane.xlu1 %2001 }
 0x3c3   :  { %3356 = vrcp.f32 %v2002_v12 }
 0x3c5   :  { %v1999_v13 = vpop.xlane.xlu0 %1998 }
 0x3c6   :  { %3358 = vrcp.f32 %v1999_v13  ;;  %v1990_v14 = vpop.xlane.xlu1 %1989 }
 0x3c7   :  { %v3349_v15 = vpop.eup %3348  ;;  %3360 = vrcp.f32 %v1990_v14 }
 0x3c8   :  { %v2018_v17 = vmul.f32 %v3349_v15, %v1996_v8 }
 0x3ca   :  { %v2026_v18 = vsub.f32 2.0, %v2018_v17  ;;  %v3994_v19 = vpop.xlane.xlu0 %2004  ;;  %v1038_v23 = vpop.permute.xlu1 %1037 }
 0x3cb   :  { %v3351_v28 = vpop.eup %3350  ;;  %3362 = vrcp.f32 %v3994_v19  ;;  %v1125_v34 = vcombine.low %v1026_v7, %v1038_v23  ;;  %v1126_v20 = vcombine.high %v1026_v7, %v1038_v23 }
 0x3cc   :  { %v3353_v29 = vpop.eup %3352  ;;  %v2034_v31 = vmul.f32 %v3349_v15, %v2026_v18  ;;  %v2015_v32 = vmul.f32 %v3351_v28, %v1987_v9 }
 0x3cd   :  { %v2014_v35 = vmul.f32 %v3353_v29, %v1984_v10  ;;  %v1133_v24 = vrot.slane %v1125_v34, %v3766_v39  ;;  %v1140_v40 = vrot.slane %v1126_v20, %v3766_v39 }
 0x3ce   :  { %v3998_v41 = vmul.f32 %v3932_v16, %v2034_v31  ;;  %v2023_v42 = vsub.f32 2.0, %v2015_v32  ;;  %v1032_v43 = vpop.permute.xlu0 %1031 }
 0x3cf   :  { %v3355_v45 = vpop.eup %3354  ;;  %v2022_v47 = vsub.f32 2.0, %v2014_v35  ;;  %v1109_v48 = vcombine.low %v3927_v37, %v1032_v43  ;;  %v1110_v49 = vcombine.high %v3927_v37, %v1032_v43 }
 0x3d0   :  { %v3357_v51 = vpop.eup %3356  ;;  %2050 = vst.msk [vmem:[#allocation17 + $0x20] sm:$0xff] %vm1313_vm2, %v3998_v41  ;;  %v2031_v52 = vmul.f32 %v3351_v28, %v2023_v42  ;;  %v2017_v53 = vmul.f32 %v3355_v45, %v1993_v11 }
 0x3d1   :  { %v2030_v25 = vmul.f32 %v3353_v29, %v2022_v47  ;;  %v2020_v16 = vmul.f32 %v3357_v51, %v2002_v12  ;;  %v1117_v26 = vrot.slane %v1109_v48, %v3766_v39  ;;  %v1124_v54 = vrot.slane %v1110_v49, %v3766_v39 }
 0x3d2   :  { %v2039_v36 = vmul.f32 %v3942_v33, %v2031_v52  ;;  %v2025_v38 = vsub.f32 2.0, %v2017_v53 }
 0x3d3   :  { %v3359_v37 = vpop.eup %3358  ;;  %v2038_v56 = vmul.f32 %v3938_v30, %v2030_v25  ;;  %v2028_v57 = vsub.f32 2.0, %v2020_v16  ;;  %v1141_v58 = vcombine.low %v1117_v26, %v1133_v24  ;;  %v1142_v59 = vcombine.high %v1117_v26, %v1133_v24 }
 0x3d4   :  { %v3361_v60 = vpop.eup %3360  ;;  %2047 = vst.msk [vmem:[#allocation17 + $0x8] sm:$0xff] %vm1313_vm2, %v2039_v36  ;;  %v2033_v61 = vmul.f32 %v3355_v45, %v2025_v38  ;;  %v2019_v62 = vmul.f32 %v3359_v37, %v1999_v13  ;;  %v1157_v63 = vcombine.low %v1124_v54, %v1140_v40  ;;  %v1158_v3 = vcombine.high %v1124_v54, %v1140_v40 }
 0x3d5   :  { %3266 = vmatmul.mubr.msk.f32.vlgmr.msra.gmra.mxu1 %vm1313_vm2, %v2039_v36  ;;  %2046 = vst.msk [vmem:[#allocation17] sm:$0xff] %vm1313_vm2, %v2038_v56  ;;  %v2036_v33 = vmul.f32 %v3357_v51, %v2028_v57  ;;  %v2016_v21 = vmul.f32 %v3361_v60, %v1990_v14  ;;  %v1149_v6 = vrot.slane %v1141_v58, %v3770_v46 }
 0x3d6   :  { %v1156_v30 = vrot.slane %v1142_v59, %v3770_v46  ;;  %3261 = vmatmul.mubr.msk.f32.vlgmr.msra.gmra.mxu0 %vm1313_vm2, %v2038_v56  ;;  %v2041_v7 = vmul.f32 %v3948_v44, %v2033_v61  ;;  %v2027_v8 = vsub.f32 2.0, %v2019_v62  ;;  %v1165_v9 = vrot.slane %v1157_v63, %v3770_v46  ;;  %3274 = vmatpush3.msra.mxu1 %v1244_v5 }
 0x3d7   :  { %v1172_v10 = vrot.slane %v1158_v3, %v3770_v46  ;;  %3269 = vmatpush3.msra.mxu0 %v1243_v4  ;;  %v2044_v11 = vmul.f32 %v3954_v50, %v2036_v33  ;;  %v2024_v12 = vsub.f32 2.0, %v2016_v21  ;;  %3275 = vmatprep.mubr.msk.f32.mxu1 %vm3594_vm1, %v3593_v22 }
 0x3d8   :  { %v1245_v13 = vcombine.low %v1149_v6, %v1156_v30  ;;  %v3092_v14 = vcombine.high %v1149_v6, %v1156_v30  ;;  %3270 = vmatprep.mubr.msk.f32.mxu0 %vm3594_vm1, %v3593_v22  ;;  %v3363_v44 = vpop.eup %3362  ;;  %2049 = vst.msk [vmem:[#allocation17 + $0x18] sm:$0xff] %vm1313_vm2, %v2041_v7  ;;  %v2035_v15 = vmul.f32 %v3359_v37, %v2027_v8 }
 0x3d9   :  { %v1261_v4 = vcombine.low %v1165_v9, %v1172_v10  ;;  %v3093_v17 = vcombine.high %v1165_v9, %v1172_v10  ;;  %3276 = vmatmul.mubr.msk.f32.vlgmr.msra.gmra.mxu1 %vm1313_vm2, %v2041_v7  ;;  %3278 = vmatprep.subr.mxu0 %v3593_v22  ;;  %2052 = vst.msk [vmem:[#allocation17 + $0x30] sm:$0xff] %vm1313_vm2, %v2044_v11 }
 0x3da   :  { %v2032_v50 = vmul.f32 %v3361_v60, %v2024_v12  ;;  %v2021_v0 = vmul.f32 %v3363_v44, %v3994_v19  ;;  %v1252_v2 = vrot.slane %v1245_v13, %v3766_v39  ;;  %v1260_v5 = vrot.slane %v3092_v14, %v3766_v39  ;;  %3283 = vmatprep.subr.mxu1 %v3593_v22 }
 0x3db   :  { %v2043_v18 = vmul.f32 %v3960_v27, %v2035_v15  ;;  %v1268_v23 = vrot.slane %v1261_v4, %v3766_v39  ;;  %v1276_v28 = vrot.slane %v3093_v17, %v3766_v39  ;;  %3285 = vmatprep.mubr.msk.f32.mxu1 %vm3594_vm1, %v3593_v22 }
 0x3dc   :  { %v2040_v29 = vmul.f32 %v3966_v55, %v2032_v50  ;;  %v2029_v31 = vsub.f32 2.0, %v2021_v0  ;;  %v1277_v32 = vcombine.low %v1252_v2, %v1260_v5  ;;  %v1278_v19 = vcombine.high %v1252_v2, %v1260_v5 }
 0x3dd   :  { %2051 = vst.msk [vmem:[#allocation17 + $0x28] sm:$0xff] %vm1313_vm2, %v2043_v18  ;;  %v1293_v34 = vcombine.low %v1268_v23, %v1276_v28  ;;  %v1294_v35 = vcombine.high %v1268_v23, %v1276_v28 }
 0x3de   :  { %2048 = vst.msk [vmem:[#allocation17 + $0x10] sm:$0xff] %vm1313_vm2, %v2040_v29  ;;  %v2037_v42 = vmul.f32 %v3363_v44, %v2029_v31  ;;  %3271 = vmatmul.mubr.msk.f32.vlgmr.msra.gmra.mxu0 %vm1313_vm2, %v2040_v29  ;;  %v1285_v27 = vrot.slane %v1277_v32, %v3770_v46  ;;  %v1292_v43 = vrot.slane %v1278_v19, %v3770_v46 }
 0x3df   :  { %v1301_v20 = vrot.slane %v1293_v34, %v3770_v46  ;;  %3280 = vmatprep.mubr.msk.f32.mxu0 %vm3594_vm1, %v3593_v22  ;;  %v1308_v45 = vrot.slane %v1294_v35, %v3770_v46 }
 0x3e0   :  { %v2045_v55 = vmul.f32 %v3977_v1, %v2037_v42 }
 0x3e1   :  { %v1309_v47 = vcombine.low %v1285_v27, %v1301_v20  ;;  %v1310_v48 = vcombine.high %v1285_v27, %v1301_v20  ;;  %v1311_v49 = vcombine.low %v1292_v43, %v1308_v45  ;;  %v1312_v51 = vcombine.high %v1292_v43, %v1308_v45 }
 0x3e2   :  { %2053 = vst.msk [vmem:[#allocation17 + $0x38] sm:$0xff] %vm1313_vm2, %v2045_v55 }
 0x3e3   :  { %3279 = vmatpush3.msra.mxu0 %v1309_v47  ;;  %3284 = vmatpush3.msra.mxu1 %v1310_v48  ;;  %v2945_v47 = vld [vmem:[#allocation14 + $0x18] sm:$0xff]  ;;  %v2944_v48 = vld [vmem:[#allocation14 + $0x10] sm:$0xff] }
 0x3e4   :  { %3281 = vmatmul.mubr.msk.f32.vlgmr.msra.gmra.mxu0 %vm1313_vm2, %v3998_v41  ;;  %3286 = vmatmul.mubr.msk.f32.vlgmr.msra.gmra.mxu1 %vm1313_vm2, %v2043_v18 }
 0x3e5   :  { %3288 = vmatprep.subr.mxu0 %v3593_v22  ;;  %3293 = vmatprep.subr.mxu1 %v3593_v22 }
 0x3e6   :  { %3289 = vmatpush3.msra.mxu0 %v1311_v49  ;;  %3294 = vmatpush3.msra.mxu1 %v1312_v51 }
 0x3e7   :  { %3290 = vmatprep.mubr.msk.f32.mxu0 %vm3594_vm1, %v3593_v22  ;;  %3295 = vmatprep.mubr.msk.f32.mxu1 %vm3594_vm1, %v3593_v22 }
 0x3e8   :  { %3291 = vmatmul.mubr.msk.f32.vlgmr.msra.gmra.mxu0 %vm1313_vm2, %v2044_v11  ;;  %3296 = vmatmul.mubr.msk.f32.vlgmr.msra.gmra.mxu1 %vm1313_vm2, %v2045_v55 }
 0x3e9   :  { %3298 = vmatprep.subr.mxu0 %v2945_v47 }
 0x3ea   :  { %3299 = vmatpush3.msra.mxu0 %v2945_v47 }
 0x3eb   :  { %3300 = vmatprep.subr.mxu0 %v2944_v48 }
 0x3ec   :  { %3301 = vmatpush3.msra.mxu0 %v2944_v48 }
 0x495   :  { %v2196_v1 = vpop.f32.mrf.mxu1 }
 0x496   :  { %v2123_v41 = vpop.f32.mrf.mxu0 }
 0x497   :  { %v3267_v52 = vpop.f32.mrf.mxu1 }
 0x498   :  { %v3262_v53 = vpop.f32.mrf.mxu0 }
 0x499   :  { %v2342_v24 = vpop.f32.mrf.mxu1 }
 0x49a   :  { %v2654_v16 = vcombine.low %v2196_v1, %v2342_v24  ;;  %v2655_v26 = vcombine.high %v2196_v1, %v2342_v24 }
 0x49b   :  { %v3277_v25 = vpop.f32.mrf.mxu1 }
 0x49c   :  { %v2662_v37 = vrot.slane %v2654_v16, %v3766_v39  ;;  %v2669_v22 = vrot.slane %v2655_v26, %v3766_v39 }
 0x49e   :  { %v2269_v54 = vpop.f32.mrf.mxu0 }
 0x49f   :  { %v2638_v36 = vcombine.low %v2123_v41, %v2269_v54  ;;  %v2639_v38 = vcombine.high %v2123_v41, %v2269_v54 }
 0x4a0   :  { %v3272_v40 = vpop.f32.mrf.mxu0 }
 0x4a1   :  { %v2646_v56 = vrot.slane %v2638_v36, %v3766_v39  ;;  %v2653_v57 = vrot.slane %v2639_v38, %v3766_v39  ;;  %v2943_v38 = vld [vmem:[#allocation14 + $0x8] sm:$0xff]  ;;  %v2942_v40 = vld [vmem:[#allocation14] sm:$0xff] }
 0x4a2   :  { %3302 = vmatprep.subr.mxu0 %v2943_v38 }
 0x4a3   :  { %v2670_v58 = vcombine.low %v2646_v56, %v2662_v37  ;;  %v2671_v59 = vcombine.high %v2646_v56, %v2662_v37  ;;  %v2686_v60 = vcombine.low %v2653_v57, %v2669_v22  ;;  %v2687_v61 = vcombine.high %v2653_v57, %v2669_v22  ;;  %3303 = vmatpush3.msra.mxu0 %v2943_v38 }
 0x4a4   :  { %v2415_v62 = vpop.f32.mrf.mxu0  ;;  %v2488_v63 = vpop.f32.mrf.mxu1  ;;  %3304 = vmatprep.subr.mxu0 %v2942_v40 }
 0x4a5   :  { %v2678_v3 = vrot.slane %v2670_v58, %v3770_v46  ;;  %v2685_v33 = vrot.slane %v2671_v59, %v3770_v46  ;;  %v2694_v21 = vrot.slane %v2686_v60, %v3770_v46  ;;  %v2701_v6 = vrot.slane %v2687_v61, %v3770_v46  ;;  %3305 = vmatpush3.msra.mxu0 %v2942_v40 }
 0x4a6   :  { %v3282_v30 = vpop.f32.mrf.mxu0  ;;  %v3287_v7 = vpop.f32.mrf.mxu1 }
 0x4a7   :  { %v2774_v8 = vcombine.low %v2678_v3, %v2685_v33  ;;  %v3118_v9 = vcombine.high %v2678_v3, %v2685_v33  ;;  %v2790_v10 = vcombine.low %v2694_v21, %v2701_v6  ;;  %v3119_v11 = vcombine.high %v2694_v21, %v2701_v6 }
 0x4a8   :  { %v2561_v12 = vpop.f32.mrf.mxu0  ;;  %v2634_v13 = vpop.f32.mrf.mxu1 }
 0x4a9   :  { %v2706_v14 = vcombine.low %v2415_v62, %v2561_v12  ;;  %v2707_v44 = vcombine.high %v2415_v62, %v2561_v12  ;;  %v2722_v15 = vcombine.low %v2488_v63, %v2634_v13  ;;  %v2723_v4 = vcombine.high %v2488_v63, %v2634_v13 }
 0x4aa   :  { %v3292_v17 = vpop.f32.mrf.mxu0  ;;  %v3297_v50 = vpop.f32.mrf.mxu1  ;;  %v2781_v0 = vrot.slane %v2774_v8, %v3766_v39  ;;  %v2789_v2 = vrot.slane %v3118_v9, %v3766_v39  ;;  %v2797_v5 = vrot.slane %v2790_v10, %v3766_v39  ;;  %v2805_v18 = vrot.slane %v3119_v11, %v3766_v39 }
 0x4ab   :  { %v2714_v23 = vrot.slane %v2706_v14, %v3766_v39  ;;  %v2721_v28 = vrot.slane %v2707_v44, %v3766_v39  ;;  %v2730_v29 = vrot.slane %v2722_v15, %v3766_v39  ;;  %v2737_v31 = vrot.slane %v2723_v4, %v3766_v39 }
 0x4ac   :  { %v2806_v32 = vcombine.low %v2781_v0, %v2789_v2  ;;  %v2822_v19 = vcombine.low %v2797_v5, %v2805_v18  ;;  %v2807_v34 = vcombine.high %v2781_v0, %v2789_v2  ;;  %v2823_v35 = vcombine.high %v2797_v5, %v2805_v18 }
 0x4ad   :  { %v2738_v42 = vcombine.low %v2714_v23, %v2730_v29  ;;  %v2739_v27 = vcombine.high %v2714_v23, %v2730_v29  ;;  %v2754_v20 = vcombine.low %v2721_v28, %v2737_v31  ;;  %v2755_v55 = vcombine.high %v2721_v28, %v2737_v31 }
 0x4ae   :  { %v2814_v43 = vrot.slane %v2806_v32, %v3770_v46  ;;  %v2830_v45 = vrot.slane %v2822_v19, %v3770_v46  ;;  %v2821_v24 = vrot.slane %v2807_v34, %v3770_v46  ;;  %v2837_v25 = vrot.slane %v2823_v35, %v3770_v46 }
 0x4af   :  { %v2746_v49 = vrot.slane %v2738_v42, %v3770_v46  ;;  %v2753_v51 = vrot.slane %v2739_v27, %v3770_v46  ;;  %v2762_v1 = vrot.slane %v2754_v20, %v3770_v46  ;;  %v2769_v41 = vrot.slane %v2755_v55, %v3770_v46 }
 0x4b0   :  { %v2839_v52 = vcombine.high %v2814_v43, %v2830_v45  ;;  %v2838_v53 = vcombine.low %v2814_v43, %v2830_v45  ;;  %v2840_v58 = vcombine.low %v2821_v24, %v2837_v25  ;;  %v2841_v33 = vcombine.high %v2821_v24, %v2837_v25 }
 0x4b1   :  { %v2842_v16 = vcombine.low %v2746_v49, %v2753_v51  ;;  %v3120_v26 = vcombine.high %v2746_v49, %v2753_v51  ;;  %v2858_v54 = vcombine.low %v2762_v1, %v2769_v41  ;;  %v3121_v36 = vcombine.high %v2762_v1, %v2769_v41 }
 0x4b2   :  { %2912 = vrot.lane.b32.xlu0 %v2839_v52, %s3581_s14 }
 0x4b3   :  { %v2849_v37 = vrot.slane %v2842_v16, %v3766_v39  ;;  %v2857_v22 = vrot.slane %v3120_v26, %v3766_v39  ;;  %v2865_v56 = vrot.slane %v2858_v54, %v3766_v39  ;;  %v2873_v57 = vrot.slane %v3121_v36, %v3766_v39 }
 0x4b5   :  { %v2874_v59 = vcombine.low %v2849_v37, %v2857_v22  ;;  %v2890_v60 = vcombine.low %v2865_v56, %v2873_v57  ;;  %v2875_v61 = vcombine.high %v2849_v37, %v2857_v22  ;;  %v2891_v62 = vcombine.high %v2865_v56, %v2873_v57 }
 0x4b6   :  { %2920 = vrot.lane.b32.xlu0 %v2840_v58, %s3597_s10 }
 0x4b7   :  { %v2882_v63 = vrot.slane %v2874_v59, %v3770_v46  ;;  %v2898_v3 = vrot.slane %v2890_v60, %v3770_v46  ;;  %v2889_v39 = vrot.slane %v2875_v61, %v3770_v46  ;;  %v2905_v30 = vrot.slane %v2891_v62, %v3770_v46 }
 0x4b9   :  { %v2907_v21 = vcombine.high %v2882_v63, %v2898_v3  ;;  %v2906_v6 = vcombine.low %v2882_v63, %v2898_v3  ;;  %v2908_v7 = vcombine.low %v2889_v39, %v2905_v30  ;;  %v2909_v8 = vcombine.high %v2889_v39, %v2905_v30 }
 0x4ba   :  { %2928 = vrot.lane.b32.xlu0 %v2841_v33, %s3598_s5 }
 0x4bb   :  { %2914 = vrot.lane.b32.xlu1 %v2907_v21, %s3581_s14 }
 0x4bf   :  { %2922 = vrot.lane.b32.xlu1 %v2908_v7, %s3597_s10 }
 0x4c3   :  { %2930 = vrot.lane.b32.xlu1 %v2909_v8, %s3598_s5 }
 0x524   :  { %v2913_v9 = vpop.permute.xlu0 %2912 }
 0x525   :  { %v2934_v11 = vsel %vm1313_vm2, %v2838_v53, %v2913_v9 }
 0x528   :  { %v2921_v10 = vpop.permute.xlu0 %2920 }
 0x529   :  { %v2937_v12 = vsel %vm2936_vm3, %v2934_v11, %v2921_v10 }
 0x52c   :  { %v2929_v13 = vpop.permute.xlu0 %2928 }
 0x52d   :  { %v2940_v14 = vsel %vm2939_vm4, %v2937_v12, %v2929_v13  ;;  %v2915_v44 = vpop.permute.xlu1 %2914 }
 0x52e   :  { %3306 = vmatprep.mubr.msk.f32.mxu0 %vm171_vm0, %v2940_v14  ;;  %v2935_v15 = vsel %vm1313_vm2, %v2906_v6, %v2915_v44 }
 0x531   :  { %v2923_v46 = vpop.permute.xlu1 %2922 }
 0x532   :  { %v2938_v4 = vsel %vm2936_vm3, %v2935_v15, %v2923_v46 }
 0x535   :  { %v2931_v17 = vpop.permute.xlu1 %2930 }
 0x536   :  { %v2941_v50 = vsel %vm2939_vm4, %v2938_v4, %v2931_v17 }
 0x537   :  { %3307 = vmatmul.mubr.msk.f32.vlgmr.msra.gmra.mxu0 %vm171_vm0, %v2941_v50 }
 0x538   :  { %3535 = shalt.err (!%p3532_p2)
}
 0x539   :  { %3059 = dma.vmem_to_hbm [thread:$0]  %s3054_s20, 1024, %s4134_s13, [#allocation18], %s3580_s30, %s3580_s30, %s3581_s14  }
 0x53a   :  { %v3122_v0 = vld [vmem:[%s4132_s11] ss:$0 sm:$0xff]  ;;  %s3600_s25 = smov [#allocation16]  }
 0x53b   :  { %s3041_s1 = sshll.u32 %s3600_s25, 4  ;;  %s3042_s1 = int_to_ptr.vmem [resolvable:$true] %s3041_s1 }
 0x53c   :  { %s3544_s2 = scalar_lea.vmem %s3042_s1, 256  ;;  %p3549_p4 = scmp.lt.s32.totalorder %s3042_s1, %s3042_s1 }
 0x53d   :  { %p3545_p3 = scmp.ne.s32.totalorder %s3042_s1, %s3544_s2  ;;  %p3550_p5 = scmp.lt.s32.totalorder %s3544_s2, %s3544_s2 }
 0x53f   :  { %p3551_p6 = por %p3550_p5, %p3549_p4 }
 0x541   :  { %p3552_p7 = pnand %p3551_p6, %p3545_p3 }
 0x5f7   :  { %v3308_v2 = vpop.f32.mrf.mxu0 }
 0x5f8   :  { %v3031_v5 = vadd.f32 %v3308_v2, %v3122_v0 }
 0x5f9   :  { %v3025_v18 = vpop.f32.mrf.mxu0 }
 0x5fa   :  { %3035 = vst.msk [vmem:[#allocation16 + $0x8] sm:$0xff] %vm171_vm0, %v3031_v5  ;;  %v3026_v23 = vadd.f32 %v3122_v0, %v3025_v18 }
 0x5fc   :  { %3034 = vst.msk [vmem:[#allocation16] sm:$0xff] %vm171_vm0, %v3026_v23 }
 0x5fd   :  { %3555 = shalt.err (!%p3552_p7)
}
 0x5fe   :  { %3047 = dma.vmem_to_hbm [thread:$0]  %s3042_s1, 256, %s4133_s12, [#allocation4], %s3580_s30, %s3580_s30, %s3581_s14  }
 0x5ff   :  { %3574 = dma.done.wait [#allocation4], 256  }
 0x600   :  { %3575 = vsyncadd [#allocation4], 4294967040 }
 0x601   :  { %3576 = dma.done.wait [#allocation18], 1024  }
 0x602   :  { %3577 = vsyncadd [#allocation18], 4294966272 }
 0x603   :  { %3066 = vsyncpa [#allocation3], 1 }
 0x604   :  { %3067 = vsyncpa [#allocation6], 1 }
 0x605   :  { %3068 = vsyncpa [#allocation9], 1 }
 0x606   :  { %3069 = vsyncpa [#allocation12], 1 }
 0x607   :  { %3070 = vsyncpa [#allocation15], 1 }
 0x608   :  { %3071 = vsyncpa [#allocation4], 1 }
 0x609   :  { %3072 = vsyncpa [#allocation18], 1 }

</bundles_post_ra>
